<compile_context>
chip_gen: v5e
topology: v5e:2x2
jax: 0.10.0
libtpu: 0.0.40
codegen_flags: <defaults>
</compile_context>

<pallas_src>
import math

import jax
import jax.numpy as jnp
from jax import lax
from jax.experimental import pallas as pl
from jax.experimental.pallas import tpu as pltpu

LANE = 128


def _round_up(x, m):
    return ((x + m - 1) // m) * m


# ----------------------------------------------------------------------------
# Pallas kernel: recurrent part of one GRU layer, one (direction, time-chunk)
# grid step.
#   gi_ref  : (Tc, B, 3*Hp)  precomputed input gates x@W_ih^T + b_ih (+ b_hh r/z)
#   whh_ref : (Hp, 3*Hp)     W_hh^T, gate-padded to 128-lane slots
#   bhn_ref : (1, 3*Hp)      b_hh for the n gate only (zeros in r/z slots)
#   out_ref : (Tc, B, Hp)    hidden states for this direction / chunk
#   h_ref   : (B, Hp)        VMEM scratch carrying h across time chunks
# ----------------------------------------------------------------------------
def gru_kernel(gi_ref, whh_ref, bhn_ref, out_ref, h_ref):
    d = pl.program_id(0)          # direction: 0 = forward, 1 = backward
    tc, b, _ = gi_ref.shape
    hp = h_ref.shape[1]

    @pl.when(pl.program_id(1) == 0)
    def _():
        # h0 = 0 (PyTorch default), reset at the start of each direction.
        h_ref[...] = jnp.zeros_like(h_ref)

    # Hoisted bias broadcast (done once per chunk, not per step).
    bhn = jnp.broadcast_to(bhn_ref[...], (b, 3 * hp))

    def body(t, carry):
        # forward walks the chunk 0..tc-1; backward walks tc-1..0.
        tt = t + d * (tc - 1 - 2 * t)
        gi_t = gi_ref[tt]                          # (B, 3Hp)
        h_prev = h_ref[...]                        # (B, Hp)
        gh = jnp.dot(h_prev, whh_ref[...],
                     preferred_element_type=jnp.float32) + bhn
        # r and z share one lane-aligned sigmoid on the first 2*Hp lanes.
        rz = jax.nn.sigmoid(gi_t[:, :2 * hp] + gh[:, :2 * hp])
        r = rz[:, :hp]
        z = rz[:, hp:]
        n = jnp.tanh(gi_t[:, 2 * hp:] + r * gh[:, 2 * hp:])
        h_new = (1.0 - z) * n + z * h_prev
        h_ref[...] = h_new
        out_ref[tt] = h_new                        # 128-lane, unmasked store
        return carry

    lax.fori_loop(0, tc, body, 0, unroll=True)


def _pick_time_chunk(T, max_tc):
    # TODO(synk): support ragged tails with in-kernel masking; for now the
    # chunk is chosen as a divisor of T.
    tc = min(T, max_tc)
    while T % tc:
        tc -= 1
    return tc


def gru_layer_recurrent(gi_all, whh_s, bhn_s, hp, max_time_chunk=8):
    """Recurrent pass for one GRU layer (all directions).

    gi_all: (T, B, num_dirs*3*Hp) precomputed input gates (time-major).
    whh_s : (num_dirs, Hp, 3*Hp), bhn_s: (num_dirs, 1, 3*Hp).
    Returns (T, B, num_dirs*Hp) float32 (gate-padded hidden states).
    """
    T, B, _ = gi_all.shape
    nd = whh_s.shape[0]
    tc = _pick_time_chunk(T, max_time_chunk)
    nc = T // tc

    def t_block(d, i):
        # forward reads time chunks 0..nc-1, backward reads nc-1..0
        return i + d * (nc - 1 - 2 * i)

    # VMEM budget: double-buffered gi/out chunks + weights + scratch, with slack.
    block_bytes = 4 * (2 * tc * B * 3 * hp + 2 * tc * B * hp
                       + 2 * hp * 3 * hp + 2 * 3 * hp + B * hp)
    vmem_limit = int(min(64 * 1024 * 1024, max(4 * 1024 * 1024, 2 * block_bytes)))

    cost = pl.CostEstimate(
        flops=2 * nd * T * B * hp * 3 * hp,
        transcendentals=nd * T * B * 3 * hp,
        bytes_accessed=4 * (gi_all.size + T * B * nd * hp
                            + int(whh_s.size) + int(bhn_s.size)),
    )

    return pl.pallas_call(
        gru_kernel,
        out_shape=jax.ShapeDtypeStruct((T, B, nd * hp), jnp.float32),
        grid_spec=pltpu.PrefetchScalarGridSpec(
            num_scalar_prefetch=0,
            grid=(nd, nc),
            in_specs=[
                pl.BlockSpec((tc, B, 3 * hp), lambda d, i: (t_block(d, i), 0, d)),
                pl.BlockSpec((None, hp, 3 * hp), lambda d, i: (d, 0, 0)),
                pl.BlockSpec((None, 1, 3 * hp), lambda d, i: (d, 0, 0)),
            ],
            out_specs=pl.BlockSpec((tc, B, hp), lambda d, i: (t_block(d, i), 0, d)),
            scratch_shapes=[pltpu.VMEM((B, hp), jnp.float32)],
        ),
        compiler_params=pltpu.CompilerParams(
            dimension_semantics=("parallel", "arbitrary"),
            vmem_limit_bytes=vmem_limit,
        ),
        cost_estimate=cost,
    )(gi_all, whh_s, bhn_s)


# ----------------------------------------------------------------------------
# Weight packing: pad each gate's H columns into a 128-lane-aligned Hp slot,
# and (for layers > 0) pad input rows to match the padded layer outputs.
# ----------------------------------------------------------------------------
def _pad_gate_cols(m, H, Hp):
    """(..., 3H) -> (..., 3Hp): gate g lands at [g*Hp, g*Hp+H)."""
    parts = []
    for g in range(3):
        seg = m[..., g * H:(g + 1) * H]
        pad = [(0, 0)] * (m.ndim - 1) + [(0, Hp - H)]
        parts.append(jnp.pad(seg, pad))
    return jnp.concatenate(parts, axis=-1)


def _pad_input_rows(w_t, H, Hp, num_dirs_in):
    """(num_dirs_in*H, 3H) -> (num_dirs_in*Hp, 3H): dir d rows land at [d*Hp, d*Hp+H)."""
    parts = []
    for d in range(num_dirs_in):
        seg = w_t[d * H:(d + 1) * H]
        parts.append(jnp.pad(seg, ((0, Hp - H), (0, 0))))
    return jnp.concatenate(parts, axis=0)


def pack_layer_params(layer_params, H, Hp, first_layer):
    num_dirs = len(layer_params)
    wih_cols, bgi_cols, whh_list, bhn_list = [], [], [], []
    for (w_ih, w_hh, b_ih, b_hh) in layer_params:
        w_ih_t = w_ih.T                                           # (Din_raw, 3H)
        if not first_layer:
            w_ih_t = _pad_input_rows(w_ih_t, H, Hp, num_dirs)     # (nd*Hp, 3H)
        wih_cols.append(_pad_gate_cols(w_ih_t, H, Hp))            # (Din_pad, 3Hp)

        # Fold b_hh(r,z) into the precomputed input gates; the n-gate b_hh must
        # stay with gh because of the r*(W_hn h + b_hn) term.
        b_gi = jnp.concatenate([b_ih[:2 * H] + b_hh[:2 * H], b_ih[2 * H:]])
        bgi_cols.append(_pad_gate_cols(b_gi, H, Hp))              # (3Hp,)

        w_hh_t = jnp.pad(w_hh.T, ((0, Hp - H), (0, 0)))           # (Hp, 3H)
        whh_list.append(_pad_gate_cols(w_hh_t, H, Hp))            # (Hp, 3Hp)

        b_hn = jnp.concatenate([jnp.zeros((2 * H,), b_hh.dtype), b_hh[2 * H:]])
        bhn_list.append(_pad_gate_cols(b_hn, H, Hp)[None, :])     # (1, 3Hp)

    wih_all = jnp.concatenate(wih_cols, axis=-1)   # (Din_pad, nd*3Hp)
    bgi_all = jnp.concatenate(bgi_cols, axis=-1)   # (nd*3Hp,)
    whh_s = jnp.stack(whh_list)                    # (nd, Hp, 3Hp)
    bhn_s = jnp.stack(bhn_list)                    # (nd, 1, 3Hp)
    return wih_all, bgi_all, whh_s, bhn_s


# ----------------------------------------------------------------------------
# Full RNN.forward: multi-layer bidirectional GRU, batch_first.
# Dropout between layers only applies in training mode in PyTorch; this is the
# inference forward, so it is a no-op here.
# TODO(synk): inter-layer dropout if a training-mode forward is ever needed.
# TODO(synk): optional bf16 weights on v6e/v7x (keep f32 gate math for v5e).
# ----------------------------------------------------------------------------
def rnn_forward(x, params, hidden_size, max_time_chunk=8):
    """x: (B, T, D_in) -> (B, T, num_dirs * hidden_size)."""
    H = hidden_size
    Hp = _round_up(H, LANE)
    num_dirs = len(params[0])

    cur = jnp.transpose(x, (1, 0, 2)).astype(jnp.float32)   # time-major, once
    for layer_idx, layer_params in enumerate(params):
        wih_all, bgi_all, whh_s, bhn_s = pack_layer_params(
            layer_params, H, Hp, first_layer=(layer_idx == 0))
        T, B, Din = cur.shape
        # Hoisted input projection: one big matmul for all timesteps and both
        # directions (the serial loop then only carries the h-dependent matmul).
        gi = cur.reshape(T * B, Din) @ wih_all + bgi_all
        gi = gi.reshape(T, B, num_dirs * 3 * Hp)
        cur = gru_layer_recurrent(gi, whh_s, bhn_s, Hp, max_time_chunk)
        # `cur` stays gate-padded (T, B, nd*Hp); the next layer's W_ih rows are
        # padded to match, so no per-layer repack / transpose is needed.

    out = jnp.concatenate(
        [cur[:, :, d * Hp:d * Hp + H] for d in range(num_dirs)], axis=-1)
    return jnp.transpose(out, (1, 0, 2))                     # back to batch_first


# ----------------------------------------------------------------------------
# Parameter init (matches nn.GRU: uniform(-1/sqrt(H), 1/sqrt(H)))
# ----------------------------------------------------------------------------
def init_gru_params(key, input_size, hidden_size, num_layers, bidirectional):
    num_dirs = 2 if bidirectional else 1
    k = 1.0 / math.sqrt(hidden_size)
    params = []
    for layer in range(num_layers):
        layer_in = input_size if layer == 0 else hidden_size * num_dirs
        dirs = []
        for _ in range(num_dirs):
            key, k0, k1, k2, k3 = jax.random.split(key, 5)
            w_ih = jax.random.uniform(k0, (3 * hidden_size, layer_in),
                                      jnp.float32, -k, k)
            w_hh = jax.random.uniform(k1, (3 * hidden_size, hidden_size),
                                      jnp.float32, -k, k)
            b_ih = jax.random.uniform(k2, (3 * hidden_size,), jnp.float32, -k, k)
            b_hh = jax.random.uniform(k3, (3 * hidden_size,), jnp.float32, -k, k)
            dirs.append((w_ih, w_hh, b_ih, b_hh))
        params.append(dirs)
    return params


# ----------------------------------------------------------------------------
# Pure-JAX reference (lax.scan) used only to sanity-check the kernel.
# ----------------------------------------------------------------------------
def gru_layer_dir_ref(x_tm, w_ih, w_hh, b_ih, b_hh):
    H = w_hh.shape[1]
    B = x_tm.shape[1]

    def step(h_prev, x_t):
        gi = x_t @ w_ih.T + b_ih
        gh = h_prev @ w_hh.T + b_hh
        i_r, i_z, i_n = gi[:, :H], gi[:, H:2 * H], gi[:, 2 * H:]
        h_r, h_z, h_n = gh[:, :H], gh[:, H:2 * H], gh[:, 2 * H:]
        r = jax.nn.sigmoid(i_r + h_r)
        z = jax.nn.sigmoid(i_z + h_z)
        n = jnp.tanh(i_n + r * h_n)
        h = (1.0 - z) * n + z * h_prev
        return h, h

    h0 = jnp.zeros((B, H), jnp.float32)
    _, ys = lax.scan(step, h0, x_tm)
    return ys


def rnn_forward_ref(x, params):
    out = x.astype(jnp.float32)
    for layer_params in params:
        dir_outs = []
        for d, (w_ih, w_hh, b_ih, b_hh) in enumerate(layer_params):
            x_tm = jnp.transpose(out, (1, 0, 2))
            if d == 1:
                x_tm = x_tm[::-1]
            y = gru_layer_dir_ref(x_tm, w_ih, w_hh, b_ih, b_hh)
            if d == 1:
                y = y[::-1]
            dir_outs.append(jnp.transpose(y, (1, 0, 2)))
        out = jnp.concatenate(dir_outs, axis=-1)
    return out


if __name__ == "__main__":
    # RNN(input_size=16, hidden_size=32, num_layers=2, drop=0.1, bidirectional=True)
    input_size, hidden_size, num_layers = 16, 32, 2
    bidirectional = True
    B, T = 2, 16          # T=16 with time-chunk 8 exercises the chunked grid

    key = jax.random.PRNGKey(0)
    key, kx, kp = jax.random.split(key, 3)
    x = jax.random.normal(kx, (B, T, input_size), jnp.float32)
    params = init_gru_params(kp, input_size, hidden_size, num_layers,
                             bidirectional)

    out = rnn_forward(x, params, hidden_size, max_time_chunk=8)
    out = jax.block_until_ready(out)

    expected_shape = (B, T, (2 if bidirectional else 1) * hidden_size)
    assert out.shape == expected_shape, (out.shape, expected_shape)

    ref = jax.block_until_ready(rnn_forward_ref(x, params))
    assert jnp.allclose(out, ref, rtol=3e-5, atol=3e-5), "mismatch vs JAX ref"

    print("KERNEL_OK")
</pallas_src>

<mosaic_0001>
module attributes {stable_mosaic.version = 11 : i64} {
  func.func @gru_kernel(%arg0: i32, %arg1: i32, %arg2: memref<8x2x384xf32, #tpu.memory_space<vmem>>, %arg3: memref<1x128x384xf32, #tpu.memory_space<vmem>>, %arg4: memref<1x1x384xf32, #tpu.memory_space<vmem>>, %arg5: memref<8x2x128xf32, #tpu.memory_space<vmem>>, %arg6: memref<2x128xf32, #tpu.memory_space<vmem>>) attributes {dimension_semantics = [#tpu.dimension_semantics<parallel>, #tpu.dimension_semantics<arbitrary>], iteration_bounds = array<i64: 2, 2>, scalar_prefetch = 0 : i64, scratch_operands = 1 : i64, tpu.core_type = #tpu.core_type<tc>, window_params = [{transform_indices = @transform_0, window_bounds = array<i64: 8, 2, 384>}, {transform_indices = @transform_1, window_bounds = array<i64: 1, 128, 384>}, {transform_indices = @transform_2, window_bounds = array<i64: 1, 1, 384>}, {transform_indices = @transform_3, window_bounds = array<i64: 8, 2, 128>}]} {
    %c0_i32 = arith.constant 0 : i32
    %0 = arith.cmpi eq, %arg1, %c0_i32 : i32
    %1 = arith.extui %0 : i1 to i32
    %c0_i32_0 = arith.constant 0 : i32
    %2 = arith.cmpi ne, %1, %c0_i32_0 : i32
    scf.if %2 {
      %cst_131 = arith.constant 0.000000e+00 : f32
      %303 = vector.broadcast %cst_131 : f32 to vector<2x128xf32>
      %c0_132 = arith.constant 0 : index
      %c0_133 = arith.constant 0 : index
      %304 = vector.load %arg6[%c0_132, %c0_133] : memref<2x128xf32, #tpu.memory_space<vmem>>, vector<2x128xf32>
      tpu.vector_store %arg6[%c0_132, %c0_133], %303 {strides = array<i32>} : memref<2x128xf32, #tpu.memory_space<vmem>>, vector<2x128xf32>,
    } else {
    }
    %c0 = arith.constant 0 : index
    %c0_1 = arith.constant 0 : index
    %c0_2 = arith.constant 0 : index
    %3 = vector.load %arg4[%c0, %c0_1, %c0_2] : memref<1x1x384xf32, #tpu.memory_space<vmem>>, vector<1x1x384xf32>
    %4 = vector.shape_cast %3 : vector<1x1x384xf32> to vector<1x384xf32>
    %5 = vector.shape_cast %4 : vector<1x384xf32> to vector<1x384xf32>
    %6 = vector.broadcast %5 : vector<1x384xf32> to vector<2x384xf32>
    %c0_i32_3 = arith.constant 0 : i32
    %c2_i32 = arith.constant 2 : i32
    %7 = arith.muli %c2_i32, %c0_i32_3 : i32
    %c7_i32 = arith.constant 7 : i32
    %8 = arith.subi %c7_i32, %7 : i32
    %9 = arith.muli %arg0, %8 : i32
    %10 = arith.addi %c0_i32_3, %9 : i32
    %11 = arith.index_cast %10 : i32 to index
    %c0_4 = arith.constant 0 : index
    %c0_5 = arith.constant 0 : index
    %12 = vector.load %arg2[%11, %c0_4, %c0_5] : memref<8x2x384xf32, #tpu.memory_space<vmem>>, vector<1x2x384xf32>
    %13 = vector.shape_cast %12 : vector<1x2x384xf32> to vector<2x384xf32>
    %c0_6 = arith.constant 0 : index
    %c0_7 = arith.constant 0 : index
    %14 = vector.load %arg6[%c0_6, %c0_7] : memref<2x128xf32, #tpu.memory_space<vmem>>, vector<2x128xf32>
    %c0_8 = arith.constant 0 : index
    %c0_9 = arith.constant 0 : index
    %c0_10 = arith.constant 0 : index
    %15 = vector.load %arg3[%c0_8, %c0_9, %c0_10] : memref<1x128x384xf32, #tpu.memory_space<vmem>>, vector<1x128x384xf32>
    %16 = vector.shape_cast %15 : vector<1x128x384xf32> to vector<128x384xf32>
    %cst = arith.constant dense<0.000000e+00> : vector<2x384xf32>
    %17 = tpu.matmul %14, %16, %cst {dimension_numbers = #tpu.dot_dimension_numbers<[1], [0], [0], [1], [0, 0, 1, 1], [], []>} : vector<2x128xf32>, vector<128x384xf32>, vector<2x384xf32> -> vector<2x384xf32>
    %18 = arith.addf %17, %6 : vector<2x384xf32>
    %19 = vector.extract_strided_slice %13 {offsets = [0, 0], sizes = [2, 256], strides = [1, 1]} : vector<2x384xf32> to vector<2x256xf32>
    %20 = vector.extract_strided_slice %18 {offsets = [0, 0], sizes = [2, 256], strides = [1, 1]} : vector<2x384xf32> to vector<2x256xf32>
    %21 = arith.addf %19, %20 : vector<2x256xf32>
    %22 = arith.negf %21 : vector<2x256xf32>
    %23 = math.exp %22 : vector<2x256xf32>
    %cst_11 = arith.constant 1.000000e+00 : f32
    %24 = vector.broadcast %cst_11 : f32 to vector<2x256xf32>
    %25 = arith.addf %24, %23 : vector<2x256xf32>
    %26 = arith.divf %24, %25 : vector<2x256xf32>
    %27 = vector.extract_strided_slice %26 {offsets = [0, 0], sizes = [2, 128], strides = [1, 1]} : vector<2x256xf32> to vector<2x128xf32>
    %28 = vector.extract_strided_slice %26 {offsets = [0, 128], sizes = [2, 128], strides = [1, 1]} : vector<2x256xf32> to vector<2x128xf32>
    %29 = vector.extract_strided_slice %13 {offsets = [0, 256], sizes = [2, 128], strides = [1, 1]} : vector<2x384xf32> to vector<2x128xf32>
    %30 = vector.extract_strided_slice %18 {offsets = [0, 256], sizes = [2, 128], strides = [1, 1]} : vector<2x384xf32> to vector<2x128xf32>
    %31 = arith.mulf %27, %30 : vector<2x128xf32>
    %32 = arith.addf %29, %31 : vector<2x128xf32>
    %33 = math.tanh %32 : vector<2x128xf32>
    %cst_12 = arith.constant 1.000000e+00 : f32
    %34 = vector.broadcast %cst_12 : f32 to vector<2x128xf32>
    %35 = arith.subf %34, %28 : vector<2x128xf32>
    %36 = arith.mulf %35, %33 : vector<2x128xf32>
    %37 = arith.mulf %28, %14 : vector<2x128xf32>
    %38 = arith.addf %36, %37 : vector<2x128xf32>
    %c0_13 = arith.constant 0 : index
    %c0_14 = arith.constant 0 : index
    %39 = vector.load %arg6[%c0_13, %c0_14] : memref<2x128xf32, #tpu.memory_space<vmem>>, vector<2x128xf32>
    tpu.vector_store %arg6[%c0_13, %c0_14], %38 {strides = array<i32>} : memref<2x128xf32, #tpu.memory_space<vmem>>, vector<2x128xf32>,
    %40 = arith.index_cast %10 : i32 to index
    %c0_15 = arith.constant 0 : index
    %c0_16 = arith.constant 0 : index
    %41 = vector.load %arg5[%40, %c0_15, %c0_16] : memref<8x2x128xf32, #tpu.memory_space<vmem>>, vector<1x2x128xf32>
    %42 = vector.shape_cast %41 : vector<1x2x128xf32> to vector<2x128xf32>
    %43 = vector.shape_cast %38 : vector<2x128xf32> to vector<1x2x128xf32>
    tpu.vector_store %arg5[%40, %c0_15, %c0_16], %43 {strides = array<i32>} : memref<8x2x128xf32, #tpu.memory_space<vmem>>, vector<1x2x128xf32>,
    %c1_i32 = arith.constant 1 : i32
    %c2_i32_17 = arith.constant 2 : i32
    %44 = arith.muli %c2_i32_17, %c1_i32 : i32
    %c7_i32_18 = arith.constant 7 : i32
    %45 = arith.subi %c7_i32_18, %44 : i32
    %46 = arith.muli %arg0, %45 : i32
    %47 = arith.addi %c1_i32, %46 : i32
    %48 = arith.index_cast %47 : i32 to index
    %c0_19 = arith.constant 0 : index
    %c0_20 = arith.constant 0 : index
    %49 = vector.load %arg2[%48, %c0_19, %c0_20] : memref<8x2x384xf32, #tpu.memory_space<vmem>>, vector<1x2x384xf32>
    %50 = vector.shape_cast %49 : vector<1x2x384xf32> to vector<2x384xf32>
    %c0_21 = arith.constant 0 : index
    %c0_22 = arith.constant 0 : index
    %51 = vector.load %arg6[%c0_21, %c0_22] : memref<2x128xf32, #tpu.memory_space<vmem>>, vector<2x128xf32>
    %c0_23 = arith.constant 0 : index
    %c0_24 = arith.constant 0 : index
    %c0_25 = arith.constant 0 : index
    %52 = vector.load %arg3[%c0_23, %c0_24, %c0_25] : memref<1x128x384xf32, #tpu.memory_space<vmem>>, vector<1x128x384xf32>
    %53 = vector.shape_cast %52 : vector<1x128x384xf32> to vector<128x384xf32>
    %cst_26 = arith.constant dense<0.000000e+00> : vector<2x384xf32>
    %54 = tpu.matmul %51, %53, %cst_26 {dimension_numbers = #tpu.dot_dimension_numbers<[1], [0], [0], [1], [0, 0, 1, 1], [], []>} : vector<2x128xf32>, vector<128x384xf32>, vector<2x384xf32> -> vector<2x384xf32>
    %55 = arith.addf %54, %6 : vector<2x384xf32>
    %56 = vector.extract_strided_slice %50 {offsets = [0, 0], sizes = [2, 256], strides = [1, 1]} : vector<2x384xf32> to vector<2x256xf32>
    %57 = vector.extract_strided_slice %55 {offsets = [0, 0], sizes = [2, 256], strides = [1, 1]} : vector<2x384xf32> to vector<2x256xf32>
    %58 = arith.addf %56, %57 : vector<2x256xf32>
    %59 = arith.negf %58 : vector<2x256xf32>
    %60 = math.exp %59 : vector<2x256xf32>
    %cst_27 = arith.constant 1.000000e+00 : f32
    %61 = vector.broadcast %cst_27 : f32 to vector<2x256xf32>
    %62 = arith.addf %61, %60 : vector<2x256xf32>
    %63 = arith.divf %61, %62 : vector<2x256xf32>
    %64 = vector.extract_strided_slice %63 {offsets = [0, 0], sizes = [2, 128], strides = [1, 1]} : vector<2x256xf32> to vector<2x128xf32>
    %65 = vector.extract_strided_slice %63 {offsets = [0, 128], sizes = [2, 128], strides = [1, 1]} : vector<2x256xf32> to vector<2x128xf32>
    %66 = vector.extract_strided_slice %50 {offsets = [0, 256], sizes = [2, 128], strides = [1, 1]} : vector<2x384xf32> to vector<2x128xf32>
    %67 = vector.extract_strided_slice %55 {offsets = [0, 256], sizes = [2, 128], strides = [1, 1]} : vector<2x384xf32> to vector<2x128xf32>
    %68 = arith.mulf %64, %67 : vector<2x128xf32>
    %69 = arith.addf %66, %68 : vector<2x128xf32>
    %70 = math.tanh %69 : vector<2x128xf32>
    %cst_28 = arith.constant 1.000000e+00 : f32
    %71 = vector.broadcast %cst_28 : f32 to vector<2x128xf32>
    %72 = arith.subf %71, %65 : vector<2x128xf32>
    %73 = arith.mulf %72, %70 : vector<2x128xf32>
    %74 = arith.mulf %65, %51 : vector<2x128xf32>
    %75 = arith.addf %73, %74 : vector<2x128xf32>
    %c0_29 = arith.constant 0 : index
    %c0_30 = arith.constant 0 : index
    %76 = vector.load %arg6[%c0_29, %c0_30] : memref<2x128xf32, #tpu.memory_space<vmem>>, vector<2x128xf32>
    tpu.vector_store %arg6[%c0_29, %c0_30], %75 {strides = array<i32>} : memref<2x128xf32, #tpu.memory_space<vmem>>, vector<2x128xf32>,
    %77 = arith.index_cast %47 : i32 to index
    %c0_31 = arith.constant 0 : index
    %c0_32 = arith.constant 0 : index
    %78 = vector.load %arg5[%77, %c0_31, %c0_32] : memref<8x2x128xf32, #tpu.memory_space<vmem>>, vector<1x2x128xf32>
    %79 = vector.shape_cast %78 : vector<1x2x128xf32> to vector<2x128xf32>
    %80 = vector.shape_cast %75 : vector<2x128xf32> to vector<1x2x128xf32>
    tpu.vector_store %arg5[%77, %c0_31, %c0_32], %80 {strides = array<i32>} : memref<8x2x128xf32, #tpu.memory_space<vmem>>, vector<1x2x128xf32>,
    %c2_i32_33 = arith.constant 2 : i32
    %c2_i32_34 = arith.constant 2 : i32
    %81 = arith.muli %c2_i32_34, %c2_i32_33 : i32
    %c7_i32_35 = arith.constant 7 : i32
    %82 = arith.subi %c7_i32_35, %81 : i32
    %83 = arith.muli %arg0, %82 : i32
    %84 = arith.addi %c2_i32_33, %83 : i32
    %85 = arith.index_cast %84 : i32 to index
    %c0_36 = arith.constant 0 : index
    %c0_37 = arith.constant 0 : index
    %86 = vector.load %arg2[%85, %c0_36, %c0_37] : memref<8x2x384xf32, #tpu.memory_space<vmem>>, vector<1x2x384xf32>
    %87 = vector.shape_cast %86 : vector<1x2x384xf32> to vector<2x384xf32>
    %c0_38 = arith.constant 0 : index
    %c0_39 = arith.constant 0 : index
    %88 = vector.load %arg6[%c0_38, %c0_39] : memref<2x128xf32, #tpu.memory_space<vmem>>, vector<2x128xf32>
    %c0_40 = arith.constant 0 : index
    %c0_41 = arith.constant 0 : index
    %c0_42 = arith.constant 0 : index
    %89 = vector.load %arg3[%c0_40, %c0_41, %c0_42] : memref<1x128x384xf32, #tpu.memory_space<vmem>>, vector<1x128x384xf32>
    %90 = vector.shape_cast %89 : vector<1x128x384xf32> to vector<128x384xf32>
    %cst_43 = arith.constant dense<0.000000e+00> : vector<2x384xf32>
    %91 = tpu.matmul %88, %90, %cst_43 {dimension_numbers = #tpu.dot_dimension_numbers<[1], [0], [0], [1], [0, 0, 1, 1], [], []>} : vector<2x128xf32>, vector<128x384xf32>, vector<2x384xf32> -> vector<2x384xf32>
    %92 = arith.addf %91, %6 : vector<2x384xf32>
    %93 = vector.extract_strided_slice %87 {offsets = [0, 0], sizes = [2, 256], strides = [1, 1]} : vector<2x384xf32> to vector<2x256xf32>
    %94 = vector.extract_strided_slice %92 {offsets = [0, 0], sizes = [2, 256], strides = [1, 1]} : vector<2x384xf32> to vector<2x256xf32>
    %95 = arith.addf %93, %94 : vector<2x256xf32>
    %96 = arith.negf %95 : vector<2x256xf32>
    %97 = math.exp %96 : vector<2x256xf32>
    %cst_44 = arith.constant 1.000000e+00 : f32
    %98 = vector.broadcast %cst_44 : f32 to vector<2x256xf32>
    %99 = arith.addf %98, %97 : vector<2x256xf32>
    %100 = arith.divf %98, %99 : vector<2x256xf32>
    %101 = vector.extract_strided_slice %100 {offsets = [0, 0], sizes = [2, 128], strides = [1, 1]} : vector<2x256xf32> to vector<2x128xf32>
    %102 = vector.extract_strided_slice %100 {offsets = [0, 128], sizes = [2, 128], strides = [1, 1]} : vector<2x256xf32> to vector<2x128xf32>
    %103 = vector.extract_strided_slice %87 {offsets = [0, 256], sizes = [2, 128], strides = [1, 1]} : vector<2x384xf32> to vector<2x128xf32>
    %104 = vector.extract_strided_slice %92 {offsets = [0, 256], sizes = [2, 128], strides = [1, 1]} : vector<2x384xf32> to vector<2x128xf32>
    %105 = arith.mulf %101, %104 : vector<2x128xf32>
    %106 = arith.addf %103, %105 : vector<2x128xf32>
    %107 = math.tanh %106 : vector<2x128xf32>
    %cst_45 = arith.constant 1.000000e+00 : f32
    %108 = vector.broadcast %cst_45 : f32 to vector<2x128xf32>
    %109 = arith.subf %108, %102 : vector<2x128xf32>
    %110 = arith.mulf %109, %107 : vector<2x128xf32>
    %111 = arith.mulf %102, %88 : vector<2x128xf32>
    %112 = arith.addf %110, %111 : vector<2x128xf32>
    %c0_46 = arith.constant 0 : index
    %c0_47 = arith.constant 0 : index
    %113 = vector.load %arg6[%c0_46, %c0_47] : memref<2x128xf32, #tpu.memory_space<vmem>>, vector<2x128xf32>
    tpu.vector_store %arg6[%c0_46, %c0_47], %112 {strides = array<i32>} : memref<2x128xf32, #tpu.memory_space<vmem>>, vector<2x128xf32>,
    %114 = arith.index_cast %84 : i32 to index
    %c0_48 = arith.constant 0 : index
    %c0_49 = arith.constant 0 : index
    %115 = vector.load %arg5[%114, %c0_48, %c0_49] : memref<8x2x128xf32, #tpu.memory_space<vmem>>, vector<1x2x128xf32>
    %116 = vector.shape_cast %115 : vector<1x2x128xf32> to vector<2x128xf32>
    %117 = vector.shape_cast %112 : vector<2x128xf32> to vector<1x2x128xf32>
    tpu.vector_store %arg5[%114, %c0_48, %c0_49], %117 {strides = array<i32>} : memref<8x2x128xf32, #tpu.memory_space<vmem>>, vector<1x2x128xf32>,
    %c3_i32 = arith.constant 3 : i32
    %c2_i32_50 = arith.constant 2 : i32
    %118 = arith.muli %c2_i32_50, %c3_i32 : i32
    %c7_i32_51 = arith.constant 7 : i32
    %119 = arith.subi %c7_i32_51, %118 : i32
    %120 = arith.muli %arg0, %119 : i32
    %121 = arith.addi %c3_i32, %120 : i32
    %122 = arith.index_cast %121 : i32 to index
    %c0_52 = arith.constant 0 : index
    %c0_53 = arith.constant 0 : index
    %123 = vector.load %arg2[%122, %c0_52, %c0_53] : memref<8x2x384xf32, #tpu.memory_space<vmem>>, vector<1x2x384xf32>
    %124 = vector.shape_cast %123 : vector<1x2x384xf32> to vector<2x384xf32>
    %c0_54 = arith.constant 0 : index
    %c0_55 = arith.constant 0 : index
    %125 = vector.load %arg6[%c0_54, %c0_55] : memref<2x128xf32, #tpu.memory_space<vmem>>, vector<2x128xf32>
    %c0_56 = arith.constant 0 : index
    %c0_57 = arith.constant 0 : index
    %c0_58 = arith.constant 0 : index
    %126 = vector.load %arg3[%c0_56, %c0_57, %c0_58] : memref<1x128x384xf32, #tpu.memory_space<vmem>>, vector<1x128x384xf32>
    %127 = vector.shape_cast %126 : vector<1x128x384xf32> to vector<128x384xf32>
    %cst_59 = arith.constant dense<0.000000e+00> : vector<2x384xf32>
    %128 = tpu.matmul %125, %127, %cst_59 {dimension_numbers = #tpu.dot_dimension_numbers<[1], [0], [0], [1], [0, 0, 1, 1], [], []>} : vector<2x128xf32>, vector<128x384xf32>, vector<2x384xf32> -> vector<2x384xf32>
    %129 = arith.addf %128, %6 : vector<2x384xf32>
    %130 = vector.extract_strided_slice %124 {offsets = [0, 0], sizes = [2, 256], strides = [1, 1]} : vector<2x384xf32> to vector<2x256xf32>
    %131 = vector.extract_strided_slice %129 {offsets = [0, 0], sizes = [2, 256], strides = [1, 1]} : vector<2x384xf32> to vector<2x256xf32>
    %132 = arith.addf %130, %131 : vector<2x256xf32>
    %133 = arith.negf %132 : vector<2x256xf32>
    %134 = math.exp %133 : vector<2x256xf32>
    %cst_60 = arith.constant 1.000000e+00 : f32
    %135 = vector.broadcast %cst_60 : f32 to vector<2x256xf32>
    %136 = arith.addf %135, %134 : vector<2x256xf32>
    %137 = arith.divf %135, %136 : vector<2x256xf32>
    %138 = vector.extract_strided_slice %137 {offsets = [0, 0], sizes = [2, 128], strides = [1, 1]} : vector<2x256xf32> to vector<2x128xf32>
    %139 = vector.extract_strided_slice %137 {offsets = [0, 128], sizes = [2, 128], strides = [1, 1]} : vector<2x256xf32> to vector<2x128xf32>
    %140 = vector.extract_strided_slice %124 {offsets = [0, 256], sizes = [2, 128], strides = [1, 1]} : vector<2x384xf32> to vector<2x128xf32>
    %141 = vector.extract_strided_slice %129 {offsets = [0, 256], sizes = [2, 128], strides = [1, 1]} : vector<2x384xf32> to vector<2x128xf32>
    %142 = arith.mulf %138, %141 : vector<2x128xf32>
    %143 = arith.addf %140, %142 : vector<2x128xf32>
    %144 = math.tanh %143 : vector<2x128xf32>
    %cst_61 = arith.constant 1.000000e+00 : f32
    %145 = vector.broadcast %cst_61 : f32 to vector<2x128xf32>
    %146 = arith.subf %145, %139 : vector<2x128xf32>
    %147 = arith.mulf %146, %144 : vector<2x128xf32>
    %148 = arith.mulf %139, %125 : vector<2x128xf32>
    %149 = arith.addf %147, %148 : vector<2x128xf32>
    %c0_62 = arith.constant 0 : index
    %c0_63 = arith.constant 0 : index
    %150 = vector.load %arg6[%c0_62, %c0_63] : memref<2x128xf32, #tpu.memory_space<vmem>>, vector<2x128xf32>
    tpu.vector_store %arg6[%c0_62, %c0_63], %149 {strides = array<i32>} : memref<2x128xf32, #tpu.memory_space<vmem>>, vector<2x128xf32>,
    %151 = arith.index_cast %121 : i32 to index
    %c0_64 = arith.constant 0 : index
    %c0_65 = arith.constant 0 : index
    %152 = vector.load %arg5[%151, %c0_64, %c0_65] : memref<8x2x128xf32, #tpu.memory_space<vmem>>, vector<1x2x128xf32>
    %153 = vector.shape_cast %152 : vector<1x2x128xf32> to vector<2x128xf32>
    %154 = vector.shape_cast %149 : vector<2x128xf32> to vector<1x2x128xf32>
    tpu.vector_store %arg5[%151, %c0_64, %c0_65], %154 {strides = array<i32>} : memref<8x2x128xf32, #tpu.memory_space<vmem>>, vector<1x2x128xf32>,
    %c4_i32 = arith.constant 4 : i32
    %c2_i32_66 = arith.constant 2 : i32
    %155 = arith.muli %c2_i32_66, %c4_i32 : i32
    %c7_i32_67 = arith.constant 7 : i32
    %156 = arith.subi %c7_i32_67, %155 : i32
    %157 = arith.muli %arg0, %156 : i32
    %158 = arith.addi %c4_i32, %157 : i32
    %159 = arith.index_cast %158 : i32 to index
    %c0_68 = arith.constant 0 : index
    %c0_69 = arith.constant 0 : index
    %160 = vector.load %arg2[%159, %c0_68, %c0_69] : memref<8x2x384xf32, #tpu.memory_space<vmem>>, vector<1x2x384xf32>
    %161 = vector.shape_cast %160 : vector<1x2x384xf32> to vector<2x384xf32>
    %c0_70 = arith.constant 0 : index
    %c0_71 = arith.constant 0 : index
    %162 = vector.load %arg6[%c0_70, %c0_71] : memref<2x128xf32, #tpu.memory_space<vmem>>, vector<2x128xf32>
    %c0_72 = arith.constant 0 : index
    %c0_73 = arith.constant 0 : index
    %c0_74 = arith.constant 0 : index
    %163 = vector.load %arg3[%c0_72, %c0_73, %c0_74] : memref<1x128x384xf32, #tpu.memory_space<vmem>>, vector<1x128x384xf32>
    %164 = vector.shape_cast %163 : vector<1x128x384xf32> to vector<128x384xf32>
    %cst_75 = arith.constant dense<0.000000e+00> : vector<2x384xf32>
    %165 = tpu.matmul %162, %164, %cst_75 {dimension_numbers = #tpu.dot_dimension_numbers<[1], [0], [0], [1], [0, 0, 1, 1], [], []>} : vector<2x128xf32>, vector<128x384xf32>, vector<2x384xf32> -> vector<2x384xf32>
    %166 = arith.addf %165, %6 : vector<2x384xf32>
    %167 = vector.extract_strided_slice %161 {offsets = [0, 0], sizes = [2, 256], strides = [1, 1]} : vector<2x384xf32> to vector<2x256xf32>
    %168 = vector.extract_strided_slice %166 {offsets = [0, 0], sizes = [2, 256], strides = [1, 1]} : vector<2x384xf32> to vector<2x256xf32>
    %169 = arith.addf %167, %168 : vector<2x256xf32>
    %170 = arith.negf %169 : vector<2x256xf32>
    %171 = math.exp %170 : vector<2x256xf32>
    %cst_76 = arith.constant 1.000000e+00 : f32
    %172 = vector.broadcast %cst_76 : f32 to vector<2x256xf32>
    %173 = arith.addf %172, %171 : vector<2x256xf32>
    %174 = arith.divf %172, %173 : vector<2x256xf32>
    %175 = vector.extract_strided_slice %174 {offsets = [0, 0], sizes = [2, 128], strides = [1, 1]} : vector<2x256xf32> to vector<2x128xf32>
    %176 = vector.extract_strided_slice %174 {offsets = [0, 128], sizes = [2, 128], strides = [1, 1]} : vector<2x256xf32> to vector<2x128xf32>
    %177 = vector.extract_strided_slice %161 {offsets = [0, 256], sizes = [2, 128], strides = [1, 1]} : vector<2x384xf32> to vector<2x128xf32>
    %178 = vector.extract_strided_slice %166 {offsets = [0, 256], sizes = [2, 128], strides = [1, 1]} : vector<2x384xf32> to vector<2x128xf32>
    %179 = arith.mulf %175, %178 : vector<2x128xf32>
    %180 = arith.addf %177, %179 : vector<2x128xf32>
    %181 = math.tanh %180 : vector<2x128xf32>
    %cst_77 = arith.constant 1.000000e+00 : f32
    %182 = vector.broadcast %cst_77 : f32 to vector<2x128xf32>
    %183 = arith.subf %182, %176 : vector<2x128xf32>
    %184 = arith.mulf %183, %181 : vector<2x128xf32>
    %185 = arith.mulf %176, %162 : vector<2x128xf32>
    %186 = arith.addf %184, %185 : vector<2x128xf32>
    %c0_78 = arith.constant 0 : index
    %c0_79 = arith.constant 0 : index
    %187 = vector.load %arg6[%c0_78, %c0_79] : memref<2x128xf32, #tpu.memory_space<vmem>>, vector<2x128xf32>
    tpu.vector_store %arg6[%c0_78, %c0_79], %186 {strides = array<i32>} : memref<2x128xf32, #tpu.memory_space<vmem>>, vector<2x128xf32>,
    %188 = arith.index_cast %158 : i32 to index
    %c0_80 = arith.constant 0 : index
    %c0_81 = arith.constant 0 : index
    %189 = vector.load %arg5[%188, %c0_80, %c0_81] : memref<8x2x128xf32, #tpu.memory_space<vmem>>, vector<1x2x128xf32>
    %190 = vector.shape_cast %189 : vector<1x2x128xf32> to vector<2x128xf32>
    %191 = vector.shape_cast %186 : vector<2x128xf32> to vector<1x2x128xf32>
    tpu.vector_store %arg5[%188, %c0_80, %c0_81], %191 {strides = array<i32>} : memref<8x2x128xf32, #tpu.memory_space<vmem>>, vector<1x2x128xf32>,
    %c5_i32 = arith.constant 5 : i32
    %c2_i32_82 = arith.constant 2 : i32
    %192 = arith.muli %c2_i32_82, %c5_i32 : i32
    %c7_i32_83 = arith.constant 7 : i32
    %193 = arith.subi %c7_i32_83, %192 : i32
    %194 = arith.muli %arg0, %193 : i32
    %195 = arith.addi %c5_i32, %194 : i32
    %196 = arith.index_cast %195 : i32 to index
    %c0_84 = arith.constant 0 : index
    %c0_85 = arith.constant 0 : index
    %197 = vector.load %arg2[%196, %c0_84, %c0_85] : memref<8x2x384xf32, #tpu.memory_space<vmem>>, vector<1x2x384xf32>
    %198 = vector.shape_cast %197 : vector<1x2x384xf32> to vector<2x384xf32>
    %c0_86 = arith.constant 0 : index
    %c0_87 = arith.constant 0 : index
    %199 = vector.load %arg6[%c0_86, %c0_87] : memref<2x128xf32, #tpu.memory_space<vmem>>, vector<2x128xf32>
    %c0_88 = arith.constant 0 : index
    %c0_89 = arith.constant 0 : index
    %c0_90 = arith.constant 0 : index
    %200 = vector.load %arg3[%c0_88, %c0_89, %c0_90] : memref<1x128x384xf32, #tpu.memory_space<vmem>>, vector<1x128x384xf32>
    %201 = vector.shape_cast %200 : vector<1x128x384xf32> to vector<128x384xf32>
    %cst_91 = arith.constant dense<0.000000e+00> : vector<2x384xf32>
    %202 = tpu.matmul %199, %201, %cst_91 {dimension_numbers = #tpu.dot_dimension_numbers<[1], [0], [0], [1], [0, 0, 1, 1], [], []>} : vector<2x128xf32>, vector<128x384xf32>, vector<2x384xf32> -> vector<2x384xf32>
    %203 = arith.addf %202, %6 : vector<2x384xf32>
    %204 = vector.extract_strided_slice %198 {offsets = [0, 0], sizes = [2, 256], strides = [1, 1]} : vector<2x384xf32> to vector<2x256xf32>
    %205 = vector.extract_strided_slice %203 {offsets = [0, 0], sizes = [2, 256], strides = [1, 1]} : vector<2x384xf32> to vector<2x256xf32>
    %206 = arith.addf %204, %205 : vector<2x256xf32>
    %207 = arith.negf %206 : vector<2x256xf32>
    %208 = math.exp %207 : vector<2x256xf32>
    %cst_92 = arith.constant 1.000000e+00 : f32
    %209 = vector.broadcast %cst_92 : f32 to vector<2x256xf32>
    %210 = arith.addf %209, %208 : vector<2x256xf32>
    %211 = arith.divf %209, %210 : vector<2x256xf32>
    %212 = vector.extract_strided_slice %211 {offsets = [0, 0], sizes = [2, 128], strides = [1, 1]} : vector<2x256xf32> to vector<2x128xf32>
    %213 = vector.extract_strided_slice %211 {offsets = [0, 128], sizes = [2, 128], strides = [1, 1]} : vector<2x256xf32> to vector<2x128xf32>
    %214 = vector.extract_strided_slice %198 {offsets = [0, 256], sizes = [2, 128], strides = [1, 1]} : vector<2x384xf32> to vector<2x128xf32>
    %215 = vector.extract_strided_slice %203 {offsets = [0, 256], sizes = [2, 128], strides = [1, 1]} : vector<2x384xf32> to vector<2x128xf32>
    %216 = arith.mulf %212, %215 : vector<2x128xf32>
    %217 = arith.addf %214, %216 : vector<2x128xf32>
    %218 = math.tanh %217 : vector<2x128xf32>
    %cst_93 = arith.constant 1.000000e+00 : f32
    %219 = vector.broadcast %cst_93 : f32 to vector<2x128xf32>
    %220 = arith.subf %219, %213 : vector<2x128xf32>
    %221 = arith.mulf %220, %218 : vector<2x128xf32>
    %222 = arith.mulf %213, %199 : vector<2x128xf32>
    %223 = arith.addf %221, %222 : vector<2x128xf32>
    %c0_94 = arith.constant 0 : index
    %c0_95 = arith.constant 0 : index
    %224 = vector.load %arg6[%c0_94, %c0_95] : memref<2x128xf32, #tpu.memory_space<vmem>>, vector<2x128xf32>
    tpu.vector_store %arg6[%c0_94, %c0_95], %223 {strides = array<i32>} : memref<2x128xf32, #tpu.memory_space<vmem>>, vector<2x128xf32>,
    %225 = arith.index_cast %195 : i32 to index
    %c0_96 = arith.constant 0 : index
    %c0_97 = arith.constant 0 : index
    %226 = vector.load %arg5[%225, %c0_96, %c0_97] : memref<8x2x128xf32, #tpu.memory_space<vmem>>, vector<1x2x128xf32>
    %227 = vector.shape_cast %226 : vector<1x2x128xf32> to vector<2x128xf32>
    %228 = vector.shape_cast %223 : vector<2x128xf32> to vector<1x2x128xf32>
    tpu.vector_store %arg5[%225, %c0_96, %c0_97], %228 {strides = array<i32>} : memref<8x2x128xf32, #tpu.memory_space<vmem>>, vector<1x2x128xf32>,
    %c6_i32 = arith.constant 6 : i32
    %c2_i32_98 = arith.constant 2 : i32
    %229 = arith.muli %c2_i32_98, %c6_i32 : i32
    %c7_i32_99 = arith.constant 7 : i32
    %230 = arith.subi %c7_i32_99, %229 : i32
    %231 = arith.muli %arg0, %230 : i32
    %232 = arith.addi %c6_i32, %231 : i32
    %233 = arith.index_cast %232 : i32 to index
    %c0_100 = arith.constant 0 : index
    %c0_101 = arith.constant 0 : index
    %234 = vector.load %arg2[%233, %c0_100, %c0_101] : memref<8x2x384xf32, #tpu.memory_space<vmem>>, vector<1x2x384xf32>
    %235 = vector.shape_cast %234 : vector<1x2x384xf32> to vector<2x384xf32>
    %c0_102 = arith.constant 0 : index
    %c0_103 = arith.constant 0 : index
    %236 = vector.load %arg6[%c0_102, %c0_103] : memref<2x128xf32, #tpu.memory_space<vmem>>, vector<2x128xf32>
    %c0_104 = arith.constant 0 : index
    %c0_105 = arith.constant 0 : index
    %c0_106 = arith.constant 0 : index
    %237 = vector.load %arg3[%c0_104, %c0_105, %c0_106] : memref<1x128x384xf32, #tpu.memory_space<vmem>>, vector<1x128x384xf32>
    %238 = vector.shape_cast %237 : vector<1x128x384xf32> to vector<128x384xf32>
    %cst_107 = arith.constant dense<0.000000e+00> : vector<2x384xf32>
    %239 = tpu.matmul %236, %238, %cst_107 {dimension_numbers = #tpu.dot_dimension_numbers<[1], [0], [0], [1], [0, 0, 1, 1], [], []>} : vector<2x128xf32>, vector<128x384xf32>, vector<2x384xf32> -> vector<2x384xf32>
    %240 = arith.addf %239, %6 : vector<2x384xf32>
    %241 = vector.extract_strided_slice %235 {offsets = [0, 0], sizes = [2, 256], strides = [1, 1]} : vector<2x384xf32> to vector<2x256xf32>
    %242 = vector.extract_strided_slice %240 {offsets = [0, 0], sizes = [2, 256], strides = [1, 1]} : vector<2x384xf32> to vector<2x256xf32>
    %243 = arith.addf %241, %242 : vector<2x256xf32>
    %244 = arith.negf %243 : vector<2x256xf32>
    %245 = math.exp %244 : vector<2x256xf32>
    %cst_108 = arith.constant 1.000000e+00 : f32
    %246 = vector.broadcast %cst_108 : f32 to vector<2x256xf32>
    %247 = arith.addf %246, %245 : vector<2x256xf32>
    %248 = arith.divf %246, %247 : vector<2x256xf32>
    %249 = vector.extract_strided_slice %248 {offsets = [0, 0], sizes = [2, 128], strides = [1, 1]} : vector<2x256xf32> to vector<2x128xf32>
    %250 = vector.extract_strided_slice %248 {offsets = [0, 128], sizes = [2, 128], strides = [1, 1]} : vector<2x256xf32> to vector<2x128xf32>
    %251 = vector.extract_strided_slice %235 {offsets = [0, 256], sizes = [2, 128], strides = [1, 1]} : vector<2x384xf32> to vector<2x128xf32>
    %252 = vector.extract_strided_slice %240 {offsets = [0, 256], sizes = [2, 128], strides = [1, 1]} : vector<2x384xf32> to vector<2x128xf32>
    %253 = arith.mulf %249, %252 : vector<2x128xf32>
    %254 = arith.addf %251, %253 : vector<2x128xf32>
    %255 = math.tanh %254 : vector<2x128xf32>
    %cst_109 = arith.constant 1.000000e+00 : f32
    %256 = vector.broadcast %cst_109 : f32 to vector<2x128xf32>
    %257 = arith.subf %256, %250 : vector<2x128xf32>
    %258 = arith.mulf %257, %255 : vector<2x128xf32>
    %259 = arith.mulf %250, %236 : vector<2x128xf32>
    %260 = arith.addf %258, %259 : vector<2x128xf32>
    %c0_110 = arith.constant 0 : index
    %c0_111 = arith.constant 0 : index
    %261 = vector.load %arg6[%c0_110, %c0_111] : memref<2x128xf32, #tpu.memory_space<vmem>>, vector<2x128xf32>
    tpu.vector_store %arg6[%c0_110, %c0_111], %260 {strides = array<i32>} : memref<2x128xf32, #tpu.memory_space<vmem>>, vector<2x128xf32>,
    %262 = arith.index_cast %232 : i32 to index
    %c0_112 = arith.constant 0 : index
    %c0_113 = arith.constant 0 : index
    %263 = vector.load %arg5[%262, %c0_112, %c0_113] : memref<8x2x128xf32, #tpu.memory_space<vmem>>, vector<1x2x128xf32>
    %264 = vector.shape_cast %263 : vector<1x2x128xf32> to vector<2x128xf32>
    %265 = vector.shape_cast %260 : vector<2x128xf32> to vector<1x2x128xf32>
    tpu.vector_store %arg5[%262, %c0_112, %c0_113], %265 {strides = array<i32>} : memref<8x2x128xf32, #tpu.memory_space<vmem>>, vector<1x2x128xf32>,
    %c7_i32_114 = arith.constant 7 : i32
    %c2_i32_115 = arith.constant 2 : i32
    %266 = arith.muli %c2_i32_115, %c7_i32_114 : i32
    %c7_i32_116 = arith.constant 7 : i32
    %267 = arith.subi %c7_i32_116, %266 : i32
    %268 = arith.muli %arg0, %267 : i32
    %269 = arith.addi %c7_i32_114, %268 : i32
    %270 = arith.index_cast %269 : i32 to index
    %c0_117 = arith.constant 0 : index
    %c0_118 = arith.constant 0 : index
    %271 = vector.load %arg2[%270, %c0_117, %c0_118] : memref<8x2x384xf32, #tpu.memory_space<vmem>>, vector<1x2x384xf32>
    %272 = vector.shape_cast %271 : vector<1x2x384xf32> to vector<2x384xf32>
    %c0_119 = arith.constant 0 : index
    %c0_120 = arith.constant 0 : index
    %273 = vector.load %arg6[%c0_119, %c0_120] : memref<2x128xf32, #tpu.memory_space<vmem>>, vector<2x128xf32>
    %c0_121 = arith.constant 0 : index
    %c0_122 = arith.constant 0 : index
    %c0_123 = arith.constant 0 : index
    %274 = vector.load %arg3[%c0_121, %c0_122, %c0_123] : memref<1x128x384xf32, #tpu.memory_space<vmem>>, vector<1x128x384xf32>
    %275 = vector.shape_cast %274 : vector<1x128x384xf32> to vector<128x384xf32>
    %cst_124 = arith.constant dense<0.000000e+00> : vector<2x384xf32>
    %276 = tpu.matmul %273, %275, %cst_124 {dimension_numbers = #tpu.dot_dimension_numbers<[1], [0], [0], [1], [0, 0, 1, 1], [], []>} : vector<2x128xf32>, vector<128x384xf32>, vector<2x384xf32> -> vector<2x384xf32>
    %277 = arith.addf %276, %6 : vector<2x384xf32>
    %278 = vector.extract_strided_slice %272 {offsets = [0, 0], sizes = [2, 256], strides = [1, 1]} : vector<2x384xf32> to vector<2x256xf32>
    %279 = vector.extract_strided_slice %277 {offsets = [0, 0], sizes = [2, 256], strides = [1, 1]} : vector<2x384xf32> to vector<2x256xf32>
    %280 = arith.addf %278, %279 : vector<2x256xf32>
    %281 = arith.negf %280 : vector<2x256xf32>
    %282 = math.exp %281 : vector<2x256xf32>
    %cst_125 = arith.constant 1.000000e+00 : f32
    %283 = vector.broadcast %cst_125 : f32 to vector<2x256xf32>
    %284 = arith.addf %283, %282 : vector<2x256xf32>
    %285 = arith.divf %283, %284 : vector<2x256xf32>
    %286 = vector.extract_strided_slice %285 {offsets = [0, 0], sizes = [2, 128], strides = [1, 1]} : vector<2x256xf32> to vector<2x128xf32>
    %287 = vector.extract_strided_slice %285 {offsets = [0, 128], sizes = [2, 128], strides = [1, 1]} : vector<2x256xf32> to vector<2x128xf32>
    %288 = vector.extract_strided_slice %272 {offsets = [0, 256], sizes = [2, 128], strides = [1, 1]} : vector<2x384xf32> to vector<2x128xf32>
    %289 = vector.extract_strided_slice %277 {offsets = [0, 256], sizes = [2, 128], strides = [1, 1]} : vector<2x384xf32> to vector<2x128xf32>
    %290 = arith.mulf %286, %289 : vector<2x128xf32>
    %291 = arith.addf %288, %290 : vector<2x128xf32>
    %292 = math.tanh %291 : vector<2x128xf32>
    %cst_126 = arith.constant 1.000000e+00 : f32
    %293 = vector.broadcast %cst_126 : f32 to vector<2x128xf32>
    %294 = arith.subf %293, %287 : vector<2x128xf32>
    %295 = arith.mulf %294, %292 : vector<2x128xf32>
    %296 = arith.mulf %287, %273 : vector<2x128xf32>
    %297 = arith.addf %295, %296 : vector<2x128xf32>
    %c0_127 = arith.constant 0 : index
    %c0_128 = arith.constant 0 : index
    %298 = vector.load %arg6[%c0_127, %c0_128] : memref<2x128xf32, #tpu.memory_space<vmem>>, vector<2x128xf32>
    tpu.vector_store %arg6[%c0_127, %c0_128], %297 {strides = array<i32>} : memref<2x128xf32, #tpu.memory_space<vmem>>, vector<2x128xf32>,
    %299 = arith.index_cast %269 : i32 to index
    %c0_129 = arith.constant 0 : index
    %c0_130 = arith.constant 0 : index
    %300 = vector.load %arg5[%299, %c0_129, %c0_130] : memref<8x2x128xf32, #tpu.memory_space<vmem>>, vector<1x2x128xf32>
    %301 = vector.shape_cast %300 : vector<1x2x128xf32> to vector<2x128xf32>
    %302 = vector.shape_cast %297 : vector<2x128xf32> to vector<1x2x128xf32>
    tpu.vector_store %arg5[%299, %c0_129, %c0_130], %302 {strides = array<i32>} : memref<8x2x128xf32, #tpu.memory_space<vmem>>, vector<1x2x128xf32>,
    %c8_i32 = arith.constant 8 : i32
    return
  }
  func.func @transform_0(%arg0: i32, %arg1: i32) -> (i32, i32, i32) {
    %c2_i32 = arith.constant 2 : i32
    %0 = arith.muli %c2_i32, %arg1 : i32
    %c1_i32 = arith.constant 1 : i32
    %1 = arith.subi %c1_i32, %0 : i32
    %2 = arith.muli %arg0, %1 : i32
    %3 = arith.addi %arg1, %2 : i32
    %c0_i32 = arith.constant 0 : i32
    %c0_i32_0 = arith.constant 0 : i32
    return %3, %c0_i32, %arg0 : i32, i32, i32
  }
  func.func @transform_1(%arg0: i32, %arg1: i32) -> (i32, i32, i32) {
    %c0_i32 = arith.constant 0 : i32
    %c0_i32_0 = arith.constant 0 : i32
    %c0_i32_1 = arith.constant 0 : i32
    return %arg0, %c0_i32, %c0_i32_0 : i32, i32, i32
  }
  func.func @transform_2(%arg0: i32, %arg1: i32) -> (i32, i32, i32) {
    %c0_i32 = arith.constant 0 : i32
    %c0_i32_0 = arith.constant 0 : i32
    %c0_i32_1 = arith.constant 0 : i32
    return %arg0, %c0_i32, %c0_i32_0 : i32, i32, i32
  }
  func.func @transform_3(%arg0: i32, %arg1: i32) -> (i32, i32, i32) {
    %c2_i32 = arith.constant 2 : i32
    %0 = arith.muli %c2_i32, %arg1 : i32
    %c1_i32 = arith.constant 1 : i32
    %1 = arith.subi %c1_i32, %0 : i32
    %2 = arith.muli %arg0, %1 : i32
    %3 = arith.addi %arg1, %2 : i32
    %c0_i32 = arith.constant 0 : i32
    %c0_i32_0 = arith.constant 0 : i32
    return %3, %c0_i32, %arg0 : i32, i32, i32
  }
}

</mosaic_0001>

<bundles_post_ra>
// kernel: tpu_custom_call.1
= control target key start
LH: loop header
LB: loop body
LE: loop exit
PB: predicated region body
PF: predicated region fallthrough
CT: control target
= control target key end

     0   :  { %s3332_s0 = inlined_call_operand.hbm [shape: f32[16,2,768], index: 0, kind: input, shape index: {}]   ;;  %s3333_s1 = inlined_call_operand.hbm [shape: f32[2,128,384], index: 1, kind: input, shape index: {}]   ;;  %s3334_s2 = inlined_call_operand.hbm [shape: f32[2,1,384], index: 2, kind: input, shape index: {}]   ;;  %s3335_s3 = inlined_call_operand.hbm [shape: f32[16,2,256], index: 3, kind: output, shape index: {}]  }
   0x1   :  { %3350 = sst [smem:[#allocation24_spill]] %s3333_s1 }
   0x2   :  { %3351 = sst [smem:[#allocation25_spill]] %s3335_s3 }
   0x3   :  { %8 = vsyncpa [#allocation4], 0 }
   0x4   :  { %10 = vsyncpa [#allocation4 + $0x1], 0 }
   0x5   :  { %11 = vsyncpa [#allocation7], 0 }
   0x6   :  { %13 = vsyncpa [#allocation7 + $0x1], 0 }
   0x7   :  { %14 = vsyncpa [#allocation5], 0 }
   0x8   :  { %16 = vsyncpa [#allocation5 + $0x1], 0  ;;  %s2283_s12 = smov 0   ;;  %s2285_s13 = smov 0  }
   0x9   :  { %s2287_s14 = smov 0   ;;  %s2289_s15 = smov 0  }
   0xa   :  { %s2291_s16 = smov 0   ;;  %s2293_s17 = smov 0  }
   0xb   :  { %s2295_s18 = smov 0   ;;  %s2297_s19 = smov 0  }
   0xc   :  { %s2299_s20 = smov 0   ;;  %s2301_s21 = smov 0  }
   0xd   :  { %s2303_s22 = smov 0  }
   0xe LB: > { %3352 = sst [smem:[#allocation13_spill]] %s2224_s15  ;;  %s2337_s23 = sadd.s32 4294967295, %s2252_s22   ;;  %s2252_s22 = sphi %s2303_s22, %s22_s22   ;;  %s2248_s21 = sphi %s2301_s21, %s3395_s21   ;;  %s2244_s20 = sphi %s2299_s20, %s3386_s20   ;;  %s2240_s19 = sphi %s2297_s19, %s3394_s19   ;;  %s2236_s18 = sphi %s2295_s18, %s3393_s18   ;;  %s2232_s17 = sphi %s2293_s17, %s3384_s17   ;;  %s2228_s16 = sphi %s2291_s16, %s3392_s16   ;;  %s2224_s15 = sphi %s2289_s15, %s3391_s15   ;;  %s2220_s14 = sphi %s2287_s14, %s3390_s14   ;;  %s2216_s13 = sphi %s2285_s13, %s3389_s13   ;;  %s2212_s12 = sphi %s2283_s12, %s3388_s12  }
   0xf   : > { %3353 = sst [smem:[#allocation14_spill]] %s2232_s17  ;;  %p59_p0 = scmp.eq.s32.totalorder %s2252_s22, 0 }
  0x10   : > { %3354 = sst [smem:[#allocation15_spill]] %s2240_s19  ;;  %p65_p1 = scmp.eq.s32.totalorder %s2337_s23, 0 }
  0x11   : > { %3355 = sst [smem:[#allocation16_spill]] %s2244_s20  ;;  %p84_p2 = scmp.ne.s32.totalorder %s2220_s14, %s2216_s13 }
  0x12   : > { %3356 = sst [smem:[#allocation17_spill]] %s2252_s22  ;;  %p90_p3 = scmp.ne.s32.totalorder %s2216_s13, %s2212_s12 }
  0x13   : > { %p3339_p4 = scmp.lt.s32.totalorder %s2252_s22, 4  ;;  %p86_p5 = por %p84_p2, %p59_p0 }
  0x14   : > { %p2350_p6 = por %p90_p3, %p65_p1  ;;  %s205_s26 = sand.u32 1, %s2252_s22  }
  0x15   : > { %s3336_s27 = sand.u32 1, %s2220_s14   ;;  %s1861_s29 = smul.u32 384, %s2248_s21 }
  0x16   : > { %s1860_s28 = smul.u32 384, %s3336_s27  ;;  %p2361_p7 = pnand %p3339_p4, %p86_p5 }
  0x17   : > { %s3359_s1 = sld [smem:[#allocation24_spill]]  ;;  %p1809_p8 = scmp.ge.s32.totalorder %s2252_s22, 1 }
  0x18   : > { %s209_s7 = scalar_lea.vmem [#allocation6], %s1860_s28  ;;  %s2369_s10 = scalar_lea.sflag [#allocation7], %s205_s26 }
  0x19   : > { %s217_s8 = sshll.u32 %s209_s7, 4  ;;  %s2254_s11 = smov 384   ;;  %s218_s8 = int_to_ptr.vmem [resolvable:$true] %s217_s8 }
  0x1a   : > { %s2255_s12 = smov 24   ;;  %p244_p9 = scmp.lt.s32.totalorder %s2252_s22, 5 }
  0x1b   : > { %s31_s26 = sadd.s32 1, %s2244_s20  ;;  %s34_s4 = sadd.s32 1, %s2248_s21 }
  0x1c   : > { %p2375_p10 = pnand %p1809_p8, %p244_p9  ;;  %p32_p11 = scmp.ge.s32.totalorder %s31_s26, 2 }
  0x1d   : > { %s214_s6 = scalar_lea.hbm %s3359_s1, %s1861_s29  ;;  %s1797_s29 = sadd.s32 4294967294, %s2252_s22  }
  0x1e   : > { %s215_s9 = sshll.u32 %s214_s6, 4  ;;  %s1798_s5 = sshll.u32 %s2244_s20, 1  ;;  %s216_s9 = int_to_ptr.hbm [resolvable:$true] %s215_s9 }
  0x1f   : > { %1881 = dma.hbm_to_vmem [thread:$0]  (!%p2361_p7), %s216_s9, 6144, %s218_s8, %s2369_s10, %s2254_s11, %s2254_s11, %s2255_s12  }
  0x20   : > { %s51_s6 = sadd.s32 1, %s2232_s17  ;;  %s3397_s26 = smov (%p32_p11, %s31_s26), 0 }
  0x21   : > { %3361 = sst [smem:[#allocation18_spill]] %s3397_s26  ;;  %s3399_s4 = smov (!%p32_p11, %s34_s4), %s2248_s21 }
  0x22   : > { %s39_s7 = ssub.s32 1, %s1798_s5  ;;  %s1799_s8 = sshll.u32 %s3397_s26, 1 }
  0x23   : > { %p36_p12 = scmp.ge.s32.totalorder %s3399_s4, 2  ;;  %s40_s9 = smul.u32 %s2248_s21, %s39_s7 }
  0x24   : > { %s43_s11 = ssub.s32 1, %s1799_s8  ;;  %p58_p13 = scmp.ne.s32.totalorder %s2232_s17, %s2228_s16 }
  0x25   : > { %s3401_s4 = smov (%p36_p12, %s3399_s4), 0  ;;  %s41_s12 = sadd.s32 %s2244_s20, %s40_s9 }
  0x26   : > { %3362 = sst [smem:[#allocation19_spill]] %s3401_s4  ;;  %p2399_p2 = por %p59_p0, %p58_p13 }
  0x27   : > { %s44_s27 = smul.u32 %s43_s11, %s3401_s4  ;;  %s47_s24 = ssub.s32 %s2248_s21, %s3401_s4 }
  0x28   : > { %p64_p3 = scmp.ne.s32.totalorder %s2228_s16, %s2224_s15  ;;  %p75_p5 = scmp.eq.s32.totalorder %s47_s24, 0 }
  0x29   : > { %s45_s7 = sadd.s32 %s44_s27, %s3397_s26  ;;  %p150_p8 = scmp.eq.s32.totalorder %s2337_s23, 3 }
  0x2a   : > { %s46_s8 = ssub.s32 %s41_s12, %s45_s7  ;;  %p2412_p9 = por %p65_p1, %p64_p3 }
  0x2b   : > { %s48_s1 = sor.u32 %s47_s24, %s46_s8  ;;  %p2419_p0 = por %p150_p8, %p58_p13 }
  0x2c   : > { %p49_p11 = scmp.eq.s32.totalorder %s48_s1, 0  ;;  %p156_p12 = scmp.eq.s32.totalorder %s1797_s29, 3 }
  0x2d   : > { %s3365_s20 = scalar_select %p2419_p0, 1, 0 }
  0x2e   : > { %s3367_s11 = sadd.s32 1, %s2220_s14  ;;  %p2431_p4 = por %p156_p12, %p64_p3 }
  0x2f   : > { %3366 = sst [smem:[#allocation20_spill]] %s3365_s20  ;;  %s176_s26 = sand.u32 1, %s2232_s17  }
  0x30   : > { %s2426_s4 = scalar_select %p75_p5, %s2220_s14, %s3367_s11  }
  0x31   : > { %s2429_s27 = scalar_select %p49_p11, %s2232_s17, %s51_s6  }
  0x32   : > { %3368 = sst [smem:[#allocation21_spill]] %s2426_s4  ;;  %s1858_s15 = smul.u32 48, %s176_s26 }
  0x33   : > { %3369 = sst [smem:[#allocation22_spill]] %s2429_s27  ;;  %s186_s24 = smul.u32 3, %s2248_s21 }
  0x34   : > { %s3370_s7 = scalar_select %p2431_p4, 1, 0 }
  0x35   : > { %p3372_p1 = scmp.lt.s32.totalorder %s2252_s22, 4  ;;  %s1859_s1 = smul.u32 48, %s41_s12 }
  0x36   : > { %3371 = sst [smem:[#allocation23_spill]] %s3370_s7  ;;  %s180_s29 = scalar_lea.vmem [#allocation3], %s1858_s15 }
  0x37   : > { %p2441_p13 = pnand %p3372_p1, %p2399_p2  ;;  %s2445_s11 = sshll.u32 %s180_s29, 4  ;;  %s196_s11 = int_to_ptr.vmem [resolvable:$true] %s2445_s11 }
  0x38   : > { %s190_s6 = sadd.s32 %s1859_s1, %s186_s24  ;;  %s3374_s22 = sand.u32 1, %s2220_s14  }
  0x39   : > { %s1807_s27 = sshll.u32 %s190_s6, 1  ;;  %s1862_s20 = smul.u32 3, %s3374_s22 }
  0x3a   : > { %s192_s7 = scalar_lea.hbm %s3332_s0, %s1807_s27  ;;  %s177_s3 = scalar_lea.sflag [#allocation4], %s176_s26 }
  0x3b   : > { %s193_s5 = sshll.u32 %s192_s7, 4  ;;  %p2070_p3 = pneg %p2441_p13  ;;  %s194_s5 = int_to_ptr.hbm [resolvable:$true] %s193_s5 }
  0x3c   : > { %s2066_s19 = sshra.s32 %s194_s5, 4  ;;  %s2073_s29 = scalar_lea.hbm %s3332_s0, 192  ;;  %s2067_s19 = int_to_ptr.hbm [resolvable:$true] %s2066_s19 }
  0x3d   : > { %s2068_s12 = scalar_lea.hbm %s2067_s19, 48  ;;  %p2074_p11 = scmp.lt.s32.totalorder %s2067_s19, %s3332_s0 }
  0x3e   : > { %p2069_p2 = scmp.ne.s32.totalorder %s2067_s19, %s2068_s12  ;;  %p2075_p12 = scmp.lt.s32.totalorder %s2073_s29, %s2068_s12 }
  0x40   : > { %p2071_p5 = pnand %p2070_p3, %p2069_p2  ;;  %p2076_p1 = por %p2075_p12, %p2074_p11 }
  0x42   : > { %p2072_p8 = pneg %p2071_p5 }
  0x44   : > { %p2077_p4 = pnand %p2076_p1, %p2072_p8 }
  0x46   : > { %2080 = shalt.err (!%p2077_p4)
}
  0x47   : > { %s2256_s22 = smov 192   ;;  %s2257_s26 = smov 96  }
  0x48   : > { %s2258_s4 = smov 6   ;;  %s235_s15 = scalar_lea.hbm %s3334_s2, %s186_s24 }
  0x49   : > { %1878 = dma.hbm_to_vmem [thread:$0]  (!%p2441_p13), %s194_s5, 768, %s196_s11, %s177_s3, %s2256_s22, %s2257_s26, %s2258_s4  }
  0x4a   : > { %s237_s1 = sshll.u32 %s235_s15, 4  ;;  %s231_s19 = scalar_lea.vmem [#allocation8], %s1862_s20  ;;  %s238_s1 = int_to_ptr.hbm [resolvable:$true] %s237_s1 }
  0x4b   : > { %s239_s12 = sshll.u32 %s231_s19, 4  ;;  %248 = sbr.rel (%p2375_p10) target bundleno = 1632 (0x660), region = 32  ;;  %s240_s12 = int_to_ptr.vmem [resolvable:$true] %s239_s12 }
  0x4c   : > { %1884 = dma.hbm_to_vmem [thread:$0]  (!%p2361_p7), %s238_s1, 48, %s240_s12, %s2369_s10  }
  0x4d   : > { %s2476_s29 = sand.u32 (!%p2375_p10), 1, %s2228_s16  }
  0x4e   : > { %s1864_s3 = smul.u32 (!%p2375_p10), 48, %s2476_s29  ;;  %s251_s8 = scalar_lea.sflag (!%p2375_p10), [#allocation4], %s2476_s29 }
  0x50   : > { %s2480_s11 = scalar_lea.vmem [#allocation3], %s1864_s3 }
  0x51   : > { %2199 = dma.done.wait (%p2412_p9), %s251_s8, 768  }
  0x52   : > { %2201 = vsyncadd (%p2412_p9), %s251_s8, 4294966528  ;;  %s260_s20 = sand.u32 1, %s2337_s23   ;;  %s262_s30 = sand.u32 1, %s2216_s13  }
  0x53   : > { %s1865_s10 = smul.u32 384, %s262_s30  ;;  %s261_s28 = scalar_lea.sflag [#allocation7], %s260_s20 }
  0x55   : > { %s2488_s24 = scalar_lea.vmem [#allocation6], %s1865_s10 }
  0x56   : > { %2203 = dma.done.wait (%p2350_p6), %s261_s28, 6192  }
  0x57   : > { %2205 = vsyncadd (%p2350_p6), %s261_s28, 4294961104  ;;  %s2494_s5 = smul.u32 3, %s262_s30  ;;  %s1810_s9 = sshll.u32 %s2476_s29, 4 }
  0x58   : > { %s2498_s17 = scalar_lea.vmem [#allocation9], %s1810_s9  ;;  %p1811_p4 = scmp.ne.s32.totalorder %s2236_s18, 0 }
  0x59   : > { %s274_s6 = scalar_lea.vmem [#allocation8], %s2494_s5 }
  0x5a   : > { %322 = sbr.rel (%p1811_p4) target bundleno = 97 (0x61), region = 48 }
  0x5f   : > { %v2259_v0 = vmov 0.0  }
  0x60   : > { %323 = vst [vmem:[#allocation2] sm:$0x3] %v2259_v0 }
  0x61 PF: > { %v2502_v1 = vld [vmem:[%s2488_s24 + $0x170] sm:$0xff]  ;;  %v2505_v2 = vld [vmem:[%s2488_s24 + $0x168] sm:$0xff]  ;;  %v2508_v3 = vld [vmem:[%s2488_s24 + $0x158] sm:$0xff]  ;;  %s3375_s23 = sld [smem:[#allocation15_spill]]  ;;  %vm449_vm0 = vcmask 1041408  }
  0x62   : > { %406 = vmatpush.msra.mxu1 %v2502_v1  ;;  %386 = vmatpush.msra.mxu0 %v2505_v2  ;;  %v2513_v4 = vld [vmem:[%s2488_s24 + $0x150] sm:$0xff]  ;;  %v2516_v5 = vld [vmem:[%s2488_s24 + $0x140] sm:$0xff]  ;;  %v2519_v6 = vld [vmem:[%s2488_s24 + $0x138] sm:$0xff] }
  0x63   : > { %544 = vmatpush.msra.mxu3 %v2505_v2  ;;  %v2525_v7 = vld [vmem:[%s2488_s24 + $0x128] sm:$0xff]  ;;  %v2528_v8 = vld [vmem:[%s2488_s24 + $0x120] sm:$0xff]  ;;  %v2534_v9 = vld [vmem:[%s2488_s24 + $0x110] sm:$0xff] }
  0x64   : > { %407 = vmatpush.msra.mxu1 %v2508_v3  ;;  %387 = vmatpush.msra.mxu0 %v2513_v4  ;;  %v2537_v10 = vld [vmem:[%s2488_s24 + $0x108] sm:$0xff]  ;;  %v2543_v11 = vld [vmem:[%s2488_s24 + $0xf8] sm:$0xff]  ;;  %v2546_v12 = vld [vmem:[%s2488_s24 + $0xf0] sm:$0xff] }
  0x65   : > { %545 = vmatpush.msra.mxu3 %v2513_v4  ;;  %v2552_v13 = vld [vmem:[%s2488_s24 + $0x178] sm:$0xff]  ;;  %v2555_v14 = vld [vmem:[%s2488_s24 + $0xe0] sm:$0xff]  ;;  %v2568_v17 = vld [vmem:[%s2488_s24 + $0x148] sm:$0xff] }
  0x66   : > { %408 = vmatpush.msra.mxu1 %v2516_v5  ;;  %388 = vmatpush.msra.mxu0 %v2519_v6  ;;  %v2558_v15 = vld [vmem:[%s2488_s24 + $0xd8] sm:$0xff]  ;;  %v2562_v16 = vld [vmem:[%s2488_s24 + $0x160] sm:$0xff]  ;;  %v2571_v18 = vld [vmem:[%s2488_s24 + $0xc8] sm:$0xff] }
  0x67   : > { %546 = vmatpush.msra.mxu3 %v2519_v6  ;;  %426 = vmatpush.msra.mxu2 %v2552_v13  ;;  %v2574_v19 = vld [vmem:[%s2488_s24 + $0xc0] sm:$0xff]  ;;  %v2581_v20 = vld [vmem:[%s2488_s24 + $0x130] sm:$0xff]  ;;  %v2587_v22 = vld [vmem:[%s2488_s24 + $0xa8] sm:$0xff]  ;;  %s1855_s25 = smul.u32 42, %s3375_s23  ;;  %s1828_s30 = sshll.u32 %s3375_s23, 1 }
  0x68   : > { %409 = vmatpush.msra.mxu1 %v2525_v7  ;;  %389 = vmatpush.msra.mxu0 %v2528_v8  ;;  %v2584_v21 = vld [vmem:[%s2488_s24 + $0xb0] sm:$0xff]  ;;  %v2594_v23 = vld [vmem:[%s2488_s24 + $0x118] sm:$0xff]  ;;  %v2607_v26 = vld [vmem:[%s2488_s24 + $0x100] sm:$0xff]  ;;  %s1815_s26 = smul.u32 14, %s3375_s23  ;;  %s1702_s10 = scalar_lea.vmem %s2498_s17, %s1828_s30 [#allocation9] }
  0x69   : > { %547 = vmatpush.msra.mxu3 %v2528_v8  ;;  %427 = vmatpush.msra.mxu2 %v2562_v16  ;;  %v2597_v24 = vld [vmem:[%s2488_s24 + $0x98] sm:$0xff]  ;;  %v2600_v25 = vld [vmem:[%s2488_s24 + $0x90] sm:$0xff]  ;;  %v2610_v27 = vld [vmem:[%s2488_s24 + $0x80] sm:$0xff]  ;;  %s335_s22 = scalar_lea.vmem %s2480_s11, %s1855_s25 [#allocation3]  ;;  %s1816_s27 = smul.u32 30, %s3375_s23 }
  0x6a   : > { %410 = vmatpush.msra.mxu1 %v2534_v9  ;;  %390 = vmatpush.msra.mxu0 %v2537_v10  ;;  %v2613_v28 = vld [vmem:[%s2488_s24 + $0x78] sm:$0xff]  ;;  %v2620_v29 = vld [vmem:[%s2488_s24 + $0xe8] sm:$0xff]  ;;  %v2626_v31 = vld [vmem:[%s2488_s24 + $0x60] sm:$0xff]  ;;  %s487_s4 = scalar_lea.vmem %s2498_s17, %s1815_s26 [#allocation9]  ;;  %s1819_s15 = smul.u32 10, %s3375_s23 }
  0x6b   : > { %548 = vmatpush.msra.mxu3 %v2537_v10  ;;  %428 = vmatpush.msra.mxu2 %v2568_v17  ;;  %v2623_v30 = vld [vmem:[%s2488_s24 + $0x68] sm:$0xff]  ;;  %v2633_v32 = vld [vmem:[%s2488_s24 + $0xd0] sm:$0xff]  ;;  %v2646_v35 = vld [vmem:[%s2488_s24 + $0xb8] sm:$0xff]  ;;  %s1684_s7 = scalar_lea.vmem %s2480_s11, %s1816_s27 [#allocation3]  ;;  %s1821_s19 = smul.u32 18, %s3375_s23 }
  0x6c   : > { %411 = vmatpush.msra.mxu1 %v2543_v11  ;;  %391 = vmatpush.msra.mxu0 %v2546_v12  ;;  %v2636_v33 = vld [vmem:[%s2488_s24 + $0x50] sm:$0xff]  ;;  %v2639_v34 = vld [vmem:[%s2488_s24 + $0x48] sm:$0xff]  ;;  %v2649_v36 = vld [vmem:[%s2488_s24 + $0x38] sm:$0xff]  ;;  %s1688_s1 = scalar_lea.vmem %s2498_s17, %s1819_s15 [#allocation9]  ;;  %s1824_s3 = smul.u32 6, %s3375_s23 }
  0x6d   : > { %549 = vmatpush.msra.mxu3 %v2546_v12  ;;  %429 = vmatpush.msra.mxu2 %v2581_v20  ;;  %v2652_v37 = vld [vmem:[%s2488_s24 + $0x30] sm:$0xff]  ;;  %v2659_v38 = vld [vmem:[%s2488_s24 + $0xa0] sm:$0xff]  ;;  %v2665_v40 = vld [vmem:[%s2488_s24 + $0x18] sm:$0xff]  ;;  %s1692_s12 = scalar_lea.vmem %s2480_s11, %s1821_s19 [#allocation3]  ;;  %s959_s28 = ssub.s32 4, %s3375_s23 }
  0x6e   : > { %412 = vmatpush.msra.mxu1 %v2555_v14  ;;  %392 = vmatpush.msra.mxu0 %v2558_v15  ;;  %v2662_v39 = vld [vmem:[%s2488_s24 + $0x20] sm:$0xff]  ;;  %v2672_v41 = vld [vmem:[%s2488_s24 + $0x88] sm:$0xff]  ;;  %v2684_v44 = vld [vmem:[#allocation2] sm:$0x3]  ;;  %s1696_s8 = scalar_lea.vmem %s2498_s17, %s1824_s3 [#allocation9]  ;;  %s1699_s20 = scalar_lea.vmem %s2480_s11, %s1824_s3 [#allocation3] }
  0x6f   : > { %550 = vmatpush.msra.mxu3 %v2558_v15  ;;  %430 = vmatpush.msra.mxu2 %v2594_v23  ;;  %v2675_v42 = vld [vmem:[%s2488_s24 + $0x8] sm:$0xff]  ;;  %v2678_v43 = vld [vmem:[%s2488_s24] sm:$0xff]  ;;  %v2688_v45 = vld [vmem:[%s2488_s24 + $0x70] sm:$0xff]  ;;  %s1832_s9 = sshll.u32 %s959_s28, 1  ;;  %s1833_s25 = smul.u32 4294967278, %s3375_s23 }
  0x70   : > { %413 = vmatpush.msra.mxu1 %v2571_v18  ;;  %393 = vmatpush.msra.mxu0 %v2574_v19  ;;  %v2696_v46 = vld [vmem:[%s2488_s24 + $0x58] sm:$0xff]  ;;  %v2701_v47 = vld [vmem:[%s2488_s24 + $0x40] sm:$0xff]  ;;  %v2708_v48 = vld [vmem:[%s2488_s24 + $0x28] sm:$0xff]  ;;  %s1836_s26 = smul.u32 4294967290, %s3375_s23  ;;  %s1849_s3 = sshll.u32 %s2236_s18, 1 }
  0x71   : > { %551 = vmatpush.msra.mxu3 %v2574_v19  ;;  %431 = vmatpush.msra.mxu2 %v2607_v26  ;;  %v2715_v49 = vld [vmem:[%s2488_s24 + $0x10] sm:$0xff]  ;;  %v324_v50 = vld [vmem:[%s274_s6] sm:$0x7]  ;;  %s1113_s6 = scalar_lea.vmem %s2498_s17, %s1832_s9 [#allocation9]  ;;  %s1838_s27 = smul.u32 4294967266, %s3375_s23 }
  0x72   : > { %414 = vmatpush.msra.mxu1 %v2584_v21  ;;  %394 = vmatpush.msra.mxu0 %v2587_v22  ;;  %v2829_v51 = vperm.slane %v324_v50, 1  ;;  %v2831_v52 = vperm.slane %v324_v50, 0  ;;  %v336_v58 = vld [vmem:[%s335_s22] sm:$0x3f]  ;;  %s1710_s22 = scalar_lea.vmem %s2480_s11, %s1833_s25 [#allocation3]  ;;  %s1841_s15 = smul.u32 4294967286, %s3375_s23 }
  0x73   : > { %552 = vmatpush.msra.mxu3 %v2587_v22  ;;  %432 = vmatpush.msra.mxu2 %v2620_v29  ;;  %s1843_s19 = smul.u32 4294967254, %s3375_s23  ;;  %s3376_s9 = sld [smem:[#allocation25_spill]] }
  0x74   : > { %415 = vmatpush.msra.mxu1 %v2597_v24  ;;  %395 = vmatpush.msra.mxu0 %v2600_v25  ;;  %s1605_s25 = sshll.u32 %s2498_s17, 4  ;;  %s1606_s25 = int_to_ptr.vmem [resolvable:$true] %s1605_s25 }
  0x75   : > { %553 = vmatpush.msra.mxu3 %v2600_v25  ;;  %433 = vmatpush.msra.mxu2 %v2633_v32 }
  0x76   : > { %416 = vmatpush.msra.mxu1 %v2610_v27  ;;  %396 = vmatpush.msra.mxu0 %v2613_v28 }
  0x77   : > { %554 = vmatpush.msra.mxu3 %v2613_v28  ;;  %434 = vmatpush.msra.mxu2 %v2646_v35 }
  0x78   : > { %417 = vmatpush.msra.mxu1 %v2623_v30  ;;  %397 = vmatpush.msra.mxu0 %v2626_v31 }
  0x79   : > { %555 = vmatpush.msra.mxu3 %v2626_v31  ;;  %435 = vmatpush.msra.mxu2 %v2659_v38 }
  0x7a   : > { %418 = vmatpush.msra.mxu1 %v2636_v33  ;;  %398 = vmatpush.msra.mxu0 %v2639_v34 }
  0x7b   : > { %556 = vmatpush.msra.mxu3 %v2639_v34  ;;  %436 = vmatpush.msra.mxu2 %v2672_v41 }
  0x7c   : > { %419 = vmatpush.msra.mxu1 %v2649_v36  ;;  %399 = vmatpush.msra.mxu0 %v2652_v37 }
  0x7d   : > { %557 = vmatpush.msra.mxu3 %v2652_v37  ;;  %437 = vmatpush.msra.mxu2 %v2688_v45 }
  0x7e   : > { %420 = vmatpush.msra.mxu1 %v2662_v39  ;;  %400 = vmatpush.msra.mxu0 %v2665_v40 }
  0x7f   : > { %558 = vmatpush.msra.mxu3 %v2665_v40  ;;  %438 = vmatpush.msra.mxu2 %v2696_v46 }
  0x80   : > { %421 = vmatpush.msra.mxu1 %v2675_v42  ;;  %401 = vmatpush.msra.mxu0 %v2678_v43 }
  0x81   : > { %422 = vmatmul.f32.vlgmr.msra.gmra.mxu1 %v2684_v44  ;;  %402 = vmatmul.f32.vlgmr.msra.gmra.mxu0 %v2684_v44 }
  0x82   : > { %564 = vmatpush.msrb.mxu0 %v2502_v1  ;;  %584 = vmatpush.msrb.mxu1 %v2552_v13 }
  0x83   : > { %559 = vmatpush.msra.mxu3 %v2678_v43  ;;  %439 = vmatpush.msra.mxu2 %v2701_v47 }
  0x84   : > { %565 = vmatpush.msrb.mxu0 %v2508_v3  ;;  %585 = vmatpush.msrb.mxu1 %v2562_v16 }
  0x85   : > { %721 = vmatpush.msrb.mxu3 %v2502_v1  ;;  %440 = vmatpush.msra.mxu2 %v2708_v48 }
  0x86   : > { %566 = vmatpush.msrb.mxu0 %v2516_v5  ;;  %586 = vmatpush.msrb.mxu1 %v2568_v17 }
  0x87   : > { %722 = vmatpush.msrb.mxu3 %v2508_v3  ;;  %441 = vmatpush.msra.mxu2 %v2715_v49 }
  0x88   : > { %567 = vmatpush.msrb.mxu0 %v2525_v7  ;;  %587 = vmatpush.msrb.mxu1 %v2581_v20 }
  0x89   : > { %723 = vmatpush.msrb.mxu3 %v2516_v5  ;;  %442 = vmatmul.f32.vlgmr.msra.gmra.mxu2 %v2684_v44 }
  0x8a   : > { %568 = vmatpush.msrb.mxu0 %v2534_v9  ;;  %588 = vmatpush.msrb.mxu1 %v2594_v23 }
  0x8b   : > { %701 = vmatpush.msrb.mxu2 %v2505_v2  ;;  %724 = vmatpush.msrb.mxu3 %v2525_v7 }
  0x8c   : > { %569 = vmatpush.msrb.mxu0 %v2543_v11  ;;  %589 = vmatpush.msrb.mxu1 %v2607_v26 }
  0x8d   : > { %702 = vmatpush.msrb.mxu2 %v2513_v4  ;;  %725 = vmatpush.msrb.mxu3 %v2534_v9 }
  0x8e   : > { %570 = vmatpush.msrb.mxu0 %v2555_v14  ;;  %590 = vmatpush.msrb.mxu1 %v2620_v29 }
  0x8f   : > { %703 = vmatpush.msrb.mxu2 %v2519_v6  ;;  %726 = vmatpush.msrb.mxu3 %v2543_v11 }
  0x90   : > { %571 = vmatpush.msrb.mxu0 %v2571_v18  ;;  %591 = vmatpush.msrb.mxu1 %v2633_v32 }
  0x91   : > { %704 = vmatpush.msrb.mxu2 %v2528_v8  ;;  %727 = vmatpush.msrb.mxu3 %v2555_v14 }
  0x92   : > { %572 = vmatpush.msrb.mxu0 %v2584_v21  ;;  %592 = vmatpush.msrb.mxu1 %v2646_v35 }
  0x93   : > { %705 = vmatpush.msrb.mxu2 %v2537_v10  ;;  %728 = vmatpush.msrb.mxu3 %v2571_v18 }
  0x94   : > { %573 = vmatpush.msrb.mxu0 %v2597_v24  ;;  %593 = vmatpush.msrb.mxu1 %v2659_v38 }
  0x95   : > { %706 = vmatpush.msrb.mxu2 %v2546_v12  ;;  %729 = vmatpush.msrb.mxu3 %v2584_v21 }
  0x96   : > { %574 = vmatpush.msrb.mxu0 %v2610_v27  ;;  %594 = vmatpush.msrb.mxu1 %v2672_v41 }
  0x97   : > { %707 = vmatpush.msrb.mxu2 %v2558_v15  ;;  %730 = vmatpush.msrb.mxu3 %v2597_v24 }
  0x98   : > { %575 = vmatpush.msrb.mxu0 %v2623_v30  ;;  %595 = vmatpush.msrb.mxu1 %v2688_v45 }
  0x99   : > { %708 = vmatpush.msrb.mxu2 %v2574_v19  ;;  %731 = vmatpush.msrb.mxu3 %v2610_v27 }
  0x9a   : > { %576 = vmatpush.msrb.mxu0 %v2636_v33  ;;  %596 = vmatpush.msrb.mxu1 %v2696_v46 }
  0x9b   : > { %709 = vmatpush.msrb.mxu2 %v2587_v22  ;;  %732 = vmatpush.msrb.mxu3 %v2623_v30 }
  0x9c   : > { %577 = vmatpush.msrb.mxu0 %v2649_v36  ;;  %597 = vmatpush.msrb.mxu1 %v2701_v47 }
  0x9d   : > { %710 = vmatpush.msrb.mxu2 %v2600_v25  ;;  %733 = vmatpush.msrb.mxu3 %v2636_v33 }
  0x9e   : > { %578 = vmatpush.msrb.mxu0 %v2662_v39  ;;  %598 = vmatpush.msrb.mxu1 %v2708_v48 }
  0x9f   : > { %711 = vmatpush.msrb.mxu2 %v2613_v28  ;;  %734 = vmatpush.msrb.mxu3 %v2649_v36 }
  0xa0   : > { %579 = vmatpush.msrb.mxu0 %v2675_v42  ;;  %599 = vmatpush.msrb.mxu1 %v2715_v49 }
  0xa1   : > { %712 = vmatpush.msrb.mxu2 %v2626_v31  ;;  %735 = vmatpush.msrb.mxu3 %v2662_v39 }
  0xa2   : > { %741 = vmatpush.msra.mxu0 %v2552_v13  ;;  %857 = vmatpush.msra.mxu1 %v2505_v2  ;;  %v2837_v2 = vperm.slane %v324_v50, 2 }
  0xa3   : > { %713 = vmatpush.msrb.mxu2 %v2639_v34  ;;  %736 = vmatpush.msrb.mxu3 %v2675_v42 }
  0xa4   : > { %742 = vmatpush.msra.mxu0 %v2562_v16  ;;  %858 = vmatpush.msra.mxu1 %v2513_v4 }
  0xa5   : > { %714 = vmatpush.msrb.mxu2 %v2652_v37 }
  0xa6   : > { %743 = vmatpush.msra.mxu0 %v2568_v17  ;;  %859 = vmatpush.msra.mxu1 %v2519_v6 }
  0xa7   : > { %715 = vmatpush.msrb.mxu2 %v2665_v40 }
  0xa8   : > { %744 = vmatpush.msra.mxu0 %v2581_v20  ;;  %860 = vmatpush.msra.mxu1 %v2528_v8 }
  0xa9   : > { %716 = vmatpush.msrb.mxu2 %v2678_v43 }
  0xaa   : > { %745 = vmatpush.msra.mxu0 %v2594_v23  ;;  %861 = vmatpush.msra.mxu1 %v2537_v10 }
  0xab   : > { %877 = vmatpush.msra.mxu2 %v2502_v1 }
  0xac   : > { %746 = vmatpush.msra.mxu0 %v2607_v26  ;;  %862 = vmatpush.msra.mxu1 %v2546_v12  ;;  %v474_v12 = vrot.slane %v336_v58, 4 }
  0xad   : > { %878 = vmatpush.msra.mxu2 %v2508_v3 }
  0xae   : > { %747 = vmatpush.msra.mxu0 %v2620_v29  ;;  %863 = vmatpush.msra.mxu1 %v2558_v15 }
  0xaf   : > { %879 = vmatpush.msra.mxu2 %v2516_v5 }
  0xb0   : > { %748 = vmatpush.msra.mxu0 %v2633_v32  ;;  %864 = vmatpush.msra.mxu1 %v2574_v19 }
  0xb1   : > { %880 = vmatpush.msra.mxu2 %v2525_v7 }
  0xb2   : > { %749 = vmatpush.msra.mxu0 %v2646_v35  ;;  %865 = vmatpush.msra.mxu1 %v2587_v22 }
  0xb3   : > { %881 = vmatpush.msra.mxu2 %v2534_v9 }
  0xb4   : > { %750 = vmatpush.msra.mxu0 %v2659_v38  ;;  %866 = vmatpush.msra.mxu1 %v2600_v25 }
  0xb5   : > { %882 = vmatpush.msra.mxu2 %v2543_v11 }
  0xb6   : > { %751 = vmatpush.msra.mxu0 %v2672_v41  ;;  %867 = vmatpush.msra.mxu1 %v2613_v28 }
  0xb7   : > { %883 = vmatpush.msra.mxu2 %v2555_v14 }
  0xb8   : > { %752 = vmatpush.msra.mxu0 %v2688_v45  ;;  %868 = vmatpush.msra.mxu1 %v2626_v31 }
  0xb9   : > { %884 = vmatpush.msra.mxu2 %v2571_v18 }
  0xba   : > { %753 = vmatpush.msra.mxu0 %v2696_v46  ;;  %869 = vmatpush.msra.mxu1 %v2639_v34 }
  0xbb   : > { %885 = vmatpush.msra.mxu2 %v2584_v21 }
  0xbc   : > { %754 = vmatpush.msra.mxu0 %v2701_v47  ;;  %870 = vmatpush.msra.mxu1 %v2652_v37 }
  0xbd   : > { %886 = vmatpush.msra.mxu2 %v2597_v24 }
  0xbe   : > { %755 = vmatpush.msra.mxu0 %v2708_v48  ;;  %871 = vmatpush.msra.mxu1 %v2665_v40 }
  0xbf   : > { %887 = vmatpush.msra.mxu2 %v2610_v27 }
  0xc0   : > { %756 = vmatpush.msra.mxu0 %v2715_v49  ;;  %872 = vmatpush.msra.mxu1 %v2678_v43 }
  0xc1   : > { %888 = vmatpush.msra.mxu2 %v2623_v30 }
  0xc3   : > { %889 = vmatpush.msra.mxu2 %v2636_v33 }
  0xc5   : > { %890 = vmatpush.msra.mxu2 %v2649_v36 }
  0xc7   : > { %891 = vmatpush.msra.mxu2 %v2662_v39 }
  0xc9   : > { %892 = vmatpush.msra.mxu2 %v2675_v42 }
  0xfe   : > { %v423_v53 = vpop.f32.mrf.mxu1  ;;  %v403_v54 = vpop.f32.mrf.mxu0 }
  0xff   : > { %v424_v55 = vadd.f32 %v423_v53, %v2829_v51  ;;  %v404_v56 = vadd.f32 %v403_v54, %v2831_v52 }
 0x101   : > { %v448_v57 = vrot.slane %v424_v55, 6 }
 0x103   : > { %v450_v59 = vsel %vm449_vm0, %v404_v56, %v448_v57 }
 0x104   : > { %v452_v60 = vadd.f32 %v450_v59, %v336_v58 }
 0x106   : > { %v1814_v61 = vmul.f32 -1.442695, %v452_v60 }
 0x108   : > { %1988 = vpow2.f32 %v1814_v61 }
 0x10c   : > { %v443_v4 = vpop.f32.mrf.mxu2 }
 0x10d   : > { %v444_v8 = vadd.f32 %v443_v4, %v2837_v2 }
 0x10e   : > { %v1989_v62 = vpop.eup %1988 }
 0x10f   : > { %v456_v63 = vadd.f32 1.0, %v1989_v62  ;;  %v1822_v62 = vld [vmem:[%s1692_s12 + $0xc] sm:$0x3f]  ;;  %s1726_s12 = scalar_lea.vmem %s2480_s11, %s1843_s19 [#allocation3]  ;;  %s2146_s19 = scalar_lea.hbm %s3376_s9, 64 }
 0x111   : > { %1990 = vrcp.f32 %v456_v63  ;;  %v468_v5 = vand.u32 2147483648, %v456_v63  ;;  %v466_v7 = vand.u32 2147483647, %v456_v63  ;;  %vm462_vm2 = vweird.f32 %v456_v63 }
 0x113   : > { %v469_v10 = vor.u32 1.1754944e-38, %v468_v5  ;;  %vm467_vm4 = vcmp.eq.f32.partialorder %v466_v7, 8.507059e+37 }
 0x117   : > { %v1991_v0 = vpop.eup %1990 }
 0x118   : > { %v458_v1 = vmul.f32 %v1991_v0, %v456_v63  ;;  %vm463_vm1 = vweird.f32 %v1991_v0 }
 0x119   : > { %vm464_vm3 = vmor %vm462_vm2, %vm463_vm1 }
 0x11a   : > { %v459_v3 = vsub.f32 1.0, %v458_v1 }
 0x11c   : > { %v460_v6 = vmul.f32 %v1991_v0, %v459_v3 }
 0x11e   : > { %v461_v9 = vadd.f32 %v1991_v0, %v460_v6 }
 0x120   : > { %v465_v11 = vsel %vm464_vm3, %v1991_v0, %v461_v9 }
 0x121   : > { %v470_v14 = vsel %vm467_vm4, %v469_v10, %v465_v11 }
 0x122   : > { %v472_v15 = vmul.f32 %v470_v14, %v444_v8  ;;  %v479_v19 = vrot.slane %v470_v14, 2 }
 0x124   : > { %v476_v18 = vadd.f32 %v474_v12, %v472_v15  ;;  %v481_v21 = vsub.f32 1.0, %v479_v19  ;;  %v483_v25 = vmul.f32 %v479_v19, %v2684_v44 }
 0x126   : > { %1992 = vtanh.f32 %v476_v18 }
 0x12c   : > { %v1993_v22 = vpop.eup %1992 }
 0x12d   : > { %v482_v24 = vmul.f32 %v1993_v22, %v481_v21  ;;  %v788_v21 = vrot.slane %v1822_v62, 4 }
 0x12f   : > { %v484_v27 = vadd.f32 %v483_v25, %v482_v24 }
 0x131   : > { %485 = vst [vmem:[#allocation2] sm:$0x3] %v484_v27 }
 0x132   : > { %488 = vst [vmem:[%s487_s4] sm:$0x3] %v484_v27  ;;  %s1714_s4 = scalar_lea.vmem %s2498_s17, %s1836_s26 [#allocation9] }
 0x138   : > { %v495_v28 = vld [vmem:[#allocation2] sm:$0x3] }
 0x139   : > { %560 = vmatmul.f32.vlgmr.msra.gmra.mxu3 %v495_v28  ;;  %580 = vmatmul.f32.vlgmr.msrb.gmra.mxu0 %v495_v28 }
 0x13a   : > { %600 = vmatmul.f32.vlgmr.msrb.gmra.mxu1 %v495_v28  ;;  %897 = vmatpush.msra.mxu3 %v2552_v13 }
 0x13c   : > { %898 = vmatpush.msra.mxu3 %v2562_v16 }
 0x13e   : > { %899 = vmatpush.msra.mxu3 %v2568_v17 }
 0x140   : > { %900 = vmatpush.msra.mxu3 %v2581_v20 }
 0x142   : > { %901 = vmatpush.msra.mxu3 %v2594_v23  ;;  %v1817_v23 = vld [vmem:[%s1684_s7 + $0x6] sm:$0x3f]  ;;  %s1718_s7 = scalar_lea.vmem %s2480_s11, %s1838_s27 [#allocation3]  ;;  %s1587_s27 = scalar_lea.sflag [#allocation5], %s2476_s29 }
 0x144   : > { %902 = vmatpush.msra.mxu3 %v2607_v26 }
 0x146   : > { %903 = vmatpush.msra.mxu3 %v2620_v29 }
 0x148   : > { %904 = vmatpush.msra.mxu3 %v2633_v32 }
 0x14a   : > { %905 = vmatpush.msra.mxu3 %v2646_v35 }
 0x14c   : > { %906 = vmatpush.msra.mxu3 %v2659_v38 }
 0x14e   : > { %907 = vmatpush.msra.mxu3 %v2672_v41 }
 0x150   : > { %908 = vmatpush.msra.mxu3 %v2688_v45  ;;  %v631_v45 = vrot.slane %v1817_v23, 4 }
 0x152   : > { %909 = vmatpush.msra.mxu3 %v2696_v46 }
 0x154   : > { %910 = vmatpush.msra.mxu3 %v2701_v47 }
 0x156   : > { %911 = vmatpush.msra.mxu3 %v2708_v48 }
 0x158   : > { %912 = vmatpush.msra.mxu3 %v2715_v49 }
 0x1b6   : > { %v581_v13 = vpop.f32.mrf.mxu0 }
 0x1b7   : > { %v582_v16 = vadd.f32 %v581_v13, %v2829_v51  ;;  %v601_v40 = vpop.f32.mrf.mxu1 }
 0x1b8   : > { %v602_v43 = vadd.f32 %v601_v40, %v2837_v2  ;;  %v2921_v40 = vld [vmem:[%s2488_s24 + $0x120] sm:$0xff] }
 0x1b9   : > { %v606_v20 = vrot.slane %v582_v16, 6 }
 0x1bc   : > { %v561_v17 = vpop.f32.mrf.mxu3 }
 0x1bd   : > { %v562_v26 = vadd.f32 %v561_v17, %v2831_v52 }
 0x1bf   : > { %v607_v29 = vsel %vm449_vm0, %v562_v26, %v606_v20  ;;  %v2881_v26 = vld [vmem:[%s2488_s24 + $0x168] sm:$0xff] }
 0x1c0   : > { %v609_v30 = vadd.f32 %v1817_v23, %v607_v29  ;;  %v2884_v29 = vld [vmem:[%s2488_s24 + $0x170] sm:$0xff]  ;;  %1013 = vmatpush.msrb.mxu0 %v2881_v26 }
 0x1c1   : > { %1033 = vmatpush.msrb.mxu1 %v2884_v29 }
 0x1c2   : > { %v1818_v31 = vmul.f32 -1.442695, %v609_v30  ;;  %v2887_v30 = vld [vmem:[%s2488_s24 + $0x178] sm:$0xff] }
 0x1c4   : > { %1994 = vpow2.f32 %v1818_v31  ;;  %v2893_v31 = vld [vmem:[%s2488_s24 + $0x150] sm:$0xff] }
 0x1c5   : > { %1014 = vmatpush.msrb.mxu0 %v2893_v31 }
 0x1ca   : > { %v1995_v32 = vpop.eup %1994 }
 0x1cb   : > { %v613_v33 = vadd.f32 1.0, %v1995_v32  ;;  %v2896_v32 = vld [vmem:[%s2488_s24 + $0x158] sm:$0xff] }
 0x1cc   : > { %1034 = vmatpush.msrb.mxu1 %v2896_v32 }
 0x1cd   : > { %1996 = vrcp.f32 %v613_v33  ;;  %v625_v37 = vand.u32 2147483648, %v613_v33  ;;  %v623_v39 = vand.u32 2147483647, %v613_v33  ;;  %vm619_vm6 = vweird.f32 %v613_v33 }
 0x1cf   : > { %v626_v42 = vor.u32 1.1754944e-38, %v625_v37  ;;  %vm624_vm8 = vcmp.eq.f32.partialorder %v623_v39, 8.507059e+37  ;;  %v2910_v37 = vld [vmem:[%s2488_s24 + $0x140] sm:$0xff] }
 0x1d0   : > { %1035 = vmatpush.msrb.mxu1 %v2910_v37 }
 0x1d3   : > { %v1997_v34 = vpop.eup %1996 }
 0x1d4   : > { %v615_v35 = vmul.f32 %v1997_v34, %v613_v33  ;;  %vm620_vm5 = vweird.f32 %v1997_v34  ;;  %v2899_v33 = vld [vmem:[%s2488_s24 + $0x160] sm:$0xff] }
 0x1d5   : > { %vm621_vm7 = vmor %vm619_vm6, %vm620_vm5 }
 0x1d6   : > { %v616_v36 = vsub.f32 1.0, %v615_v35 }
 0x1d8   : > { %v617_v38 = vmul.f32 %v1997_v34, %v616_v36  ;;  %v2907_v36 = vld [vmem:[%s2488_s24 + $0x138] sm:$0xff] }
 0x1d9   : > { %1015 = vmatpush.msrb.mxu0 %v2907_v36 }
 0x1da   : > { %v618_v41 = vadd.f32 %v1997_v34, %v617_v38  ;;  %v2913_v38 = vld [vmem:[%s2488_s24 + $0x148] sm:$0xff] }
 0x1db   : > { %1016 = vmatpush.msrb.mxu0 %v2921_v40 }
 0x1dc   : > { %v622_v44 = vsel %vm621_vm7, %v1997_v34, %v618_v41  ;;  %v2924_v41 = vld [vmem:[%s2488_s24 + $0x128] sm:$0xff] }
 0x1dd   : > { %v627_v46 = vsel %vm624_vm8, %v626_v42, %v622_v44  ;;  %v2927_v42 = vld [vmem:[%s2488_s24 + $0x130] sm:$0xff]  ;;  %1036 = vmatpush.msrb.mxu1 %v2924_v41 }
 0x1de   : > { %v629_v47 = vmul.f32 %v627_v46, %v602_v43  ;;  %v636_v49 = vrot.slane %v627_v46, 2  ;;  %v2931_v44 = vld [vmem:[%s1699_s20 + $0x12] sm:$0x3f]  ;;  %v2937_v46 = vld [vmem:[%s2488_s24 + $0x108] sm:$0xff] }
 0x1df   : > { %1017 = vmatpush.msrb.mxu0 %v2937_v46 }
 0x1e0   : > { %v633_v48 = vadd.f32 %v631_v45, %v629_v47  ;;  %v638_v50 = vsub.f32 1.0, %v636_v49  ;;  %v640_v55 = vmul.f32 %v636_v49, %v495_v28  ;;  %v2940_v47 = vld [vmem:[%s2488_s24 + $0x110] sm:$0xff] }
 0x1e1   : > { %1037 = vmatpush.msrb.mxu1 %v2940_v47 }
 0x1e2   : > { %1998 = vtanh.f32 %v633_v48  ;;  %v2943_v48 = vld [vmem:[%s2488_s24 + $0x118] sm:$0xff] }
 0x1e8   : > { %v1999_v53 = vpop.eup %1998 }
 0x1e9   : > { %v639_v54 = vmul.f32 %v1999_v53, %v638_v50  ;;  %v2952_v53 = vld [vmem:[%s2488_s24 + $0xf0] sm:$0xff] }
 0x1ea   : > { %1018 = vmatpush.msrb.mxu0 %v2952_v53 }
 0x1eb   : > { %v641_v56 = vadd.f32 %v640_v55, %v639_v54  ;;  %v2955_v54 = vld [vmem:[%s2488_s24 + $0xf8] sm:$0xff]  ;;  %v2958_v55 = vld [vmem:[%s2488_s24 + $0x100] sm:$0xff] }
 0x1ec   : > { %1038 = vmatpush.msrb.mxu1 %v2955_v54 }
 0x1ed   : > { %642 = vst [vmem:[#allocation2] sm:$0x3] %v641_v56 }
 0x1ee   : > { %1820 = vst [vmem:[%s1688_s1 + $0x2] sm:$0x3] %v641_v56  ;;  %s1722_s1 = scalar_lea.vmem %s2498_s17, %s1841_s15 [#allocation9] }
 0x1f4   : > { %v652_v57 = vld [vmem:[#allocation2] sm:$0x3] }
 0x1f5   : > { %717 = vmatmul.f32.vlgmr.msrb.gmra.mxu2 %v652_v57  ;;  %737 = vmatmul.f32.vlgmr.msrb.gmra.mxu3 %v652_v57 }
 0x1f6   : > { %757 = vmatmul.f32.vlgmr.msra.gmra.mxu0 %v652_v57  ;;  %1053 = vmatpush.msrb.mxu2 %v2887_v30 }
 0x1f7   : > { %1170 = vmatpush.msrb.mxu3 %v2881_v26 }
 0x1f8   : > { %1054 = vmatpush.msrb.mxu2 %v2899_v33 }
 0x1f9   : > { %1171 = vmatpush.msrb.mxu3 %v2893_v31 }
 0x1fa   : > { %1055 = vmatpush.msrb.mxu2 %v2913_v38 }
 0x1fb   : > { %1172 = vmatpush.msrb.mxu3 %v2907_v36 }
 0x1fc   : > { %1056 = vmatpush.msrb.mxu2 %v2927_v42 }
 0x1fd   : > { %1173 = vmatpush.msrb.mxu3 %v2921_v40 }
 0x1fe   : > { %1057 = vmatpush.msrb.mxu2 %v2943_v48 }
 0x1ff   : > { %1174 = vmatpush.msrb.mxu3 %v2937_v46 }
 0x200   : > { %1058 = vmatpush.msrb.mxu2 %v2958_v55 }
 0x201   : > { %1175 = vmatpush.msrb.mxu3 %v2952_v53 }
 0x273   : > { %v758_v12 = vpop.f32.mrf.mxu0 }
 0x274   : > { %v759_v18 = vadd.f32 %v758_v12, %v2837_v2  ;;  %v3035_v12 = vld [vmem:[%s2488_s24 + $0x68] sm:$0xff] }
 0x278   : > { %v718_v58 = vpop.f32.mrf.mxu2  ;;  %v738_v59 = vpop.f32.mrf.mxu3 }
 0x279   : > { %v739_v60 = vadd.f32 %v738_v59, %v2829_v51  ;;  %v719_v61 = vadd.f32 %v718_v58, %v2831_v52  ;;  %v2968_v58 = vld [vmem:[%s2488_s24 + $0xe0] sm:$0xff]  ;;  %v2971_v59 = vld [vmem:[%s2488_s24 + $0xe8] sm:$0xff] }
 0x27a   : > { %1039 = vmatpush.msrb.mxu1 %v2968_v58  ;;  %1059 = vmatpush.msrb.mxu2 %v2971_v59 }
 0x27b   : > { %v763_v63 = vrot.slane %v739_v60, 6  ;;  %v2978_v60 = vld [vmem:[%s2488_s24 + $0xc0] sm:$0xff] }
 0x27d   : > { %v764_v0 = vsel %vm449_vm0, %v719_v61, %v763_v63  ;;  %v2981_v61 = vld [vmem:[%s2488_s24 + $0xc8] sm:$0xff] }
 0x27e   : > { %v766_v1 = vadd.f32 %v1822_v62, %v764_v0  ;;  %v2984_v62 = vld [vmem:[%s2488_s24 + $0xd0] sm:$0xff]  ;;  %1040 = vmatpush.msrb.mxu1 %v2981_v61  ;;  %v2991_v63 = vld [vmem:[%s2488_s24 + $0xa8] sm:$0xff] }
 0x27f   : > { %1060 = vmatpush.msrb.mxu2 %v2984_v62  ;;  %v2994_v0 = vld [vmem:[%s2488_s24 + $0xb0] sm:$0xff] }
 0x280   : > { %v1823_v3 = vmul.f32 -1.442695, %v766_v1  ;;  %v2997_v1 = vld [vmem:[%s2488_s24 + $0xb8] sm:$0xff]  ;;  %1041 = vmatpush.msrb.mxu1 %v2994_v0 }
 0x281   : > { %1061 = vmatpush.msrb.mxu2 %v2997_v1 }
 0x282   : > { %2000 = vpow2.f32 %v1823_v3  ;;  %v3004_v3 = vld [vmem:[%s2488_s24 + $0x90] sm:$0xff] }
 0x288   : > { %v2001_v4 = vpop.eup %2000 }
 0x289   : > { %v770_v5 = vadd.f32 1.0, %v2001_v4  ;;  %v3007_v4 = vld [vmem:[%s2488_s24 + $0x98] sm:$0xff] }
 0x28a   : > { %1042 = vmatpush.msrb.mxu1 %v3007_v4 }
 0x28b   : > { %2002 = vrcp.f32 %v770_v5  ;;  %v782_v9 = vand.u32 2147483648, %v770_v5  ;;  %v780_v11 = vand.u32 2147483647, %v770_v5  ;;  %vm776_vm10 = vweird.f32 %v770_v5 }
 0x28d   : > { %v783_v15 = vor.u32 1.1754944e-38, %v782_v9  ;;  %vm781_vm12 = vcmp.eq.f32.partialorder %v780_v11, 8.507059e+37  ;;  %v3023_v9 = vld [vmem:[%s2488_s24 + $0x88] sm:$0xff]  ;;  %v3032_v11 = vld [vmem:[%s2488_s24 + $0x60] sm:$0xff] }
 0x291   : > { %v2003_v6 = vpop.eup %2002 }
 0x292   : > { %v772_v7 = vmul.f32 %v2003_v6, %v770_v5  ;;  %vm777_vm9 = vweird.f32 %v2003_v6  ;;  %v3010_v5 = vld [vmem:[%s2488_s24 + $0xa0] sm:$0xff] }
 0x293   : > { %vm778_vm11 = vmor %vm776_vm10, %vm777_vm9  ;;  %1062 = vmatpush.msrb.mxu2 %v3010_v5 }
 0x294   : > { %v773_v8 = vsub.f32 1.0, %v772_v7  ;;  %v3017_v7 = vld [vmem:[%s2488_s24 + $0x78] sm:$0xff] }
 0x295   : > { %1063 = vmatpush.msrb.mxu2 %v3023_v9 }
 0x296   : > { %v774_v10 = vmul.f32 %v2003_v6, %v773_v8  ;;  %v3020_v8 = vld [vmem:[%s2488_s24 + $0x80] sm:$0xff] }
 0x297   : > { %1043 = vmatpush.msrb.mxu1 %v3020_v8 }
 0x298   : > { %v775_v14 = vadd.f32 %v2003_v6, %v774_v10 }
 0x299   : > { %1044 = vmatpush.msrb.mxu1 %v3035_v12 }
 0x29a   : > { %v779_v19 = vsel %vm778_vm11, %v2003_v6, %v775_v14  ;;  %v3038_v14 = vld [vmem:[%s2488_s24 + $0x70] sm:$0xff] }
 0x29b   : > { %v784_v22 = vsel %vm781_vm12, %v783_v15, %v779_v19  ;;  %1064 = vmatpush.msrb.mxu2 %v3038_v14  ;;  %v3046_v15 = vld [vmem:[%s2488_s24 + $0x48] sm:$0xff]  ;;  %v3052_v19 = vld [vmem:[%s2488_s24 + $0x58] sm:$0xff] }
 0x29c   : > { %v786_v24 = vmul.f32 %v784_v22, %v759_v18  ;;  %v793_v27 = vrot.slane %v784_v22, 2  ;;  %v3049_v18 = vld [vmem:[%s2488_s24 + $0x50] sm:$0xff]  ;;  %v3061_v22 = vld [vmem:[%s2488_s24 + $0x38] sm:$0xff] }
 0x29d   : > { %1045 = vmatpush.msrb.mxu1 %v3049_v18  ;;  %1065 = vmatpush.msrb.mxu2 %v3052_v19 }
 0x29e   : > { %v790_v25 = vadd.f32 %v788_v21, %v786_v24  ;;  %v795_v28 = vsub.f32 1.0, %v793_v27  ;;  %v797_v17 = vmul.f32 %v793_v27, %v652_v57  ;;  %v2965_v57 = vld [vmem:[%s2488_s24 + $0xd8] sm:$0xff]  ;;  %v3058_v21 = vld [vmem:[%s2488_s24 + $0x30] sm:$0xff]  ;;  %v3064_v24 = vld [vmem:[%s2488_s24 + $0x40] sm:$0xff] }
 0x29f   : > { %1019 = vmatpush.msrb.mxu0 %v2965_v57  ;;  %1176 = vmatpush.msrb.mxu3 %v2965_v57  ;;  %v3071_v27 = vld [vmem:[%s2488_s24 + $0x20] sm:$0xff] }
 0x2a0   : > { %2004 = vtanh.f32 %v790_v25  ;;  %v3068_v25 = vld [vmem:[%s2488_s24 + $0x18] sm:$0xff]  ;;  %1046 = vmatpush.msrb.mxu1 %v3061_v22  ;;  %1066 = vmatpush.msrb.mxu2 %v3064_v24 }
 0x2a1   : > { %1020 = vmatpush.msrb.mxu0 %v2978_v60  ;;  %1177 = vmatpush.msrb.mxu3 %v2978_v60 }
 0x2a2   : > { %1047 = vmatpush.msrb.mxu1 %v3071_v27 }
 0x2a3   : > { %1021 = vmatpush.msrb.mxu0 %v2991_v63  ;;  %1178 = vmatpush.msrb.mxu3 %v2991_v63 }
 0x2a5   : > { %1022 = vmatpush.msrb.mxu0 %v3004_v3  ;;  %1179 = vmatpush.msrb.mxu3 %v3004_v3 }
 0x2a6   : > { %v2005_v13 = vpop.eup %2004 }
 0x2a7   : > { %v796_v16 = vmul.f32 %v2005_v13, %v795_v28  ;;  %1023 = vmatpush.msrb.mxu0 %v3017_v7  ;;  %1180 = vmatpush.msrb.mxu3 %v3017_v7  ;;  %v3077_v28 = vld [vmem:[%s2488_s24 + $0x28] sm:$0xff]  ;;  %v3081_v13 = vld [vmem:[%s2488_s24] sm:$0xff] }
 0x2a8   : > { %1067 = vmatpush.msrb.mxu2 %v3077_v28 }
 0x2a9   : > { %v798_v20 = vadd.f32 %v797_v17, %v796_v16  ;;  %1024 = vmatpush.msrb.mxu0 %v3032_v11  ;;  %1181 = vmatpush.msrb.mxu3 %v3032_v11  ;;  %v3084_v16 = vld [vmem:[%s2488_s24 + $0x8] sm:$0xff] }
 0x2aa   : > { %1048 = vmatpush.msrb.mxu1 %v3084_v16 }
 0x2ab   : > { %799 = vst [vmem:[#allocation2] sm:$0x3] %v798_v20  ;;  %1025 = vmatpush.msrb.mxu0 %v3046_v15  ;;  %1182 = vmatpush.msrb.mxu3 %v3046_v15 }
 0x2ac   : > { %1825 = vst [vmem:[%s1696_s8 + $0x4] sm:$0x3] %v798_v20  ;;  %v3090_v20 = vld [vmem:[%s2488_s24 + $0x10] sm:$0xff]  ;;  %s1856_s24 = smul.u32 6, %s959_s28  ;;  %s1595_s8 = ssub.s32 1, %s1849_s3 }
 0x2ad   : > { %1026 = vmatpush.msrb.mxu0 %v3058_v21  ;;  %1183 = vmatpush.msrb.mxu3 %v3058_v21 }
 0x2ae   : > { %1068 = vmatpush.msrb.mxu2 %v3090_v20  ;;  %s962_s5 = scalar_lea.vmem %s2480_s11, %s1856_s24 [#allocation3]  ;;  %s1596_s11 = smul.u32 %s3375_s23, %s1595_s8 }
 0x2af   : > { %1027 = vmatpush.msrb.mxu0 %v3068_v25  ;;  %1184 = vmatpush.msrb.mxu3 %v3068_v25 }
 0x2b0   : > { %s1597_s20 = sadd.s32 %s2236_s18, %s1596_s11  ;;  %s1846_s18 = smul.u32 4294967282, %s3375_s23 }
 0x2b1   : > { %1028 = vmatpush.msrb.mxu0 %v3081_v13  ;;  %1185 = vmatpush.msrb.mxu3 %v3081_v13  ;;  %s1857_s30 = sshll.u32 %s1597_s20, 4 }
 0x2b2   : > { %v2875_v23 = vld [vmem:[#allocation2] sm:$0x3] }
 0x2b3   : > { %873 = vmatmul.f32.vlgmr.msra.gmra.mxu1 %v2875_v23  ;;  %893 = vmatmul.f32.vlgmr.msra.gmra.mxu2 %v2875_v23 }
 0x2b4   : > { %913 = vmatmul.f32.vlgmr.msra.gmra.mxu3 %v2875_v23  ;;  %1190 = vmatpush.msra.mxu0 %v2884_v29 }
 0x2b5   : > { %1210 = vmatpush.msra.mxu1 %v2887_v30  ;;  %1327 = vmatpush.msra.mxu2 %v2881_v26 }
 0x2b6   : > { %1191 = vmatpush.msra.mxu0 %v2896_v32  ;;  %1347 = vmatpush.msra.mxu3 %v2884_v29 }
 0x2b7   : > { %1211 = vmatpush.msra.mxu1 %v2899_v33  ;;  %1328 = vmatpush.msra.mxu2 %v2893_v31 }
 0x2b8   : > { %1192 = vmatpush.msra.mxu0 %v2910_v37  ;;  %1348 = vmatpush.msra.mxu3 %v2896_v32 }
 0x2b9   : > { %1212 = vmatpush.msra.mxu1 %v2913_v38  ;;  %1329 = vmatpush.msra.mxu2 %v2907_v36 }
 0x2ba   : > { %1193 = vmatpush.msra.mxu0 %v2924_v41  ;;  %1349 = vmatpush.msra.mxu3 %v2910_v37 }
 0x2bb   : > { %1213 = vmatpush.msra.mxu1 %v2927_v42  ;;  %1330 = vmatpush.msra.mxu2 %v2921_v40 }
 0x2bc   : > { %1194 = vmatpush.msra.mxu0 %v2940_v47  ;;  %1350 = vmatpush.msra.mxu3 %v2924_v41 }
 0x2bd   : > { %1214 = vmatpush.msra.mxu1 %v2943_v48  ;;  %1331 = vmatpush.msra.mxu2 %v2937_v46 }
 0x2be   : > { %1195 = vmatpush.msra.mxu0 %v2955_v54  ;;  %1351 = vmatpush.msra.mxu3 %v2940_v47 }
 0x2bf   : > { %1215 = vmatpush.msra.mxu1 %v2958_v55  ;;  %1332 = vmatpush.msra.mxu2 %v2952_v53 }
 0x2c0   : > { %1196 = vmatpush.msra.mxu0 %v2968_v58  ;;  %1352 = vmatpush.msra.mxu3 %v2955_v54 }
 0x2c1   : > { %1216 = vmatpush.msra.mxu1 %v2971_v59  ;;  %1333 = vmatpush.msra.mxu2 %v2965_v57 }
 0x2c2   : > { %1197 = vmatpush.msra.mxu0 %v2981_v61  ;;  %1353 = vmatpush.msra.mxu3 %v2968_v58 }
 0x2c3   : > { %1217 = vmatpush.msra.mxu1 %v2984_v62  ;;  %1334 = vmatpush.msra.mxu2 %v2978_v60 }
 0x2c4   : > { %1198 = vmatpush.msra.mxu0 %v2994_v0  ;;  %1354 = vmatpush.msra.mxu3 %v2981_v61 }
 0x2c5   : > { %1218 = vmatpush.msra.mxu1 %v2997_v1  ;;  %1335 = vmatpush.msra.mxu2 %v2991_v63 }
 0x2c6   : > { %1199 = vmatpush.msra.mxu0 %v3007_v4  ;;  %1355 = vmatpush.msra.mxu3 %v2994_v0 }
 0x2c7   : > { %1219 = vmatpush.msra.mxu1 %v3010_v5  ;;  %1336 = vmatpush.msra.mxu2 %v3004_v3 }
 0x2c8   : > { %1200 = vmatpush.msra.mxu0 %v3020_v8  ;;  %1356 = vmatpush.msra.mxu3 %v3007_v4 }
 0x2c9   : > { %1220 = vmatpush.msra.mxu1 %v3023_v9  ;;  %1337 = vmatpush.msra.mxu2 %v3017_v7 }
 0x2ca   : > { %1201 = vmatpush.msra.mxu0 %v3035_v12  ;;  %1357 = vmatpush.msra.mxu3 %v3020_v8 }
 0x2cb   : > { %1221 = vmatpush.msra.mxu1 %v3038_v14  ;;  %1338 = vmatpush.msra.mxu2 %v3032_v11 }
 0x2cc   : > { %1202 = vmatpush.msra.mxu0 %v3049_v18  ;;  %1358 = vmatpush.msra.mxu3 %v3035_v12 }
 0x2cd   : > { %1222 = vmatpush.msra.mxu1 %v3052_v19  ;;  %1339 = vmatpush.msra.mxu2 %v3046_v15 }
 0x2ce   : > { %1203 = vmatpush.msra.mxu0 %v3061_v22  ;;  %1359 = vmatpush.msra.mxu3 %v3049_v18 }
 0x2cf   : > { %1223 = vmatpush.msra.mxu1 %v3064_v24  ;;  %1340 = vmatpush.msra.mxu2 %v3058_v21 }
 0x2d0   : > { %1204 = vmatpush.msra.mxu0 %v3071_v27  ;;  %1360 = vmatpush.msra.mxu3 %v3061_v22 }
 0x2d1   : > { %1224 = vmatpush.msra.mxu1 %v3077_v28  ;;  %1341 = vmatpush.msra.mxu2 %v3068_v25 }
 0x2d2   : > { %1205 = vmatpush.msra.mxu0 %v3084_v16  ;;  %1361 = vmatpush.msra.mxu3 %v3071_v27 }
 0x2d3   : > { %1225 = vmatpush.msra.mxu1 %v3090_v20  ;;  %1342 = vmatpush.msra.mxu2 %v3081_v13 }
 0x2d4   : > { %1362 = vmatpush.msra.mxu3 %v3084_v16 }
 0x330   : > { %v874_v34 = vpop.f32.mrf.mxu1 }
 0x331   : > { %v875_v43 = vadd.f32 %v874_v34, %v2831_v52 }
 0x336   : > { %v894_v35 = vpop.f32.mrf.mxu2 }
 0x337   : > { %v895_v39 = vadd.f32 %v894_v35, %v2829_v51 }
 0x339   : > { %v919_v45 = vrot.slane %v895_v39, 6 }
 0x33b   : > { %v920_v49 = vsel %vm449_vm0, %v875_v43, %v919_v45 }
 0x33c   : > { %v922_v50 = vadd.f32 %v2931_v44, %v920_v49  ;;  %v914_v49 = vpop.f32.mrf.mxu3 }
 0x33e   : > { %v1827_v56 = vmul.f32 -1.442695, %v922_v50 }
 0x340   : > { %2006 = vpow2.f32 %v1827_v56 }
 0x346   : > { %v2007_v6 = vpop.eup %2006 }
 0x347   : > { %v3026_v10 = vadd.f32 1.0, %v2007_v6  ;;  %v915_v6 = vadd.f32 %v914_v49, %v2837_v2 }
 0x349   : > { %2008 = vrcp.f32 %v3026_v10  ;;  %v938_v39 = vand.u32 2147483648, %v3026_v10  ;;  %v936_v45 = vand.u32 2147483647, %v3026_v10  ;;  %vm932_vm14 = vweird.f32 %v3026_v10 }
 0x34b   : > { %v939_v56 = vor.u32 1.1754944e-38, %v938_v39  ;;  %vm937_vm1 = vcmp.eq.f32.partialorder %v936_v45, 8.507059e+37 }
 0x34f   : > { %v2009_v17 = vpop.eup %2008 }
 0x350   : > { %v928_v34 = vmul.f32 %v2009_v17, %v3026_v10  ;;  %vm933_vm13 = vweird.f32 %v2009_v17 }
 0x351   : > { %vm934_vm15 = vmor %vm932_vm14, %vm933_vm13 }
 0x352   : > { %v929_v35 = vsub.f32 1.0, %v928_v34 }
 0x354   : > { %v930_v43 = vmul.f32 %v2009_v17, %v929_v35  ;;  %v944_v35 = vrot.slane %v2931_v44, 4 }
 0x356   : > { %v931_v50 = vadd.f32 %v2009_v17, %v930_v43 }
 0x358   : > { %v935_v34 = vsel %vm934_vm15, %v2009_v17, %v931_v50 }
 0x359   : > { %v940_v10 = vsel %vm937_vm1, %v939_v56, %v935_v34 }
 0x35a   : > { %v942_v39 = vmul.f32 %v940_v10, %v915_v6  ;;  %v949_v44 = vrot.slane %v940_v10, 2 }
 0x35c   : > { %v946_v17 = vadd.f32 %v944_v35, %v942_v39  ;;  %v951_v43 = vsub.f32 1.0, %v949_v44  ;;  %v953_v50 = vmul.f32 %v949_v44, %v2875_v23 }
 0x35e   : > { %2010 = vtanh.f32 %v946_v17 }
 0x364   : > { %v2011_v45 = vpop.eup %2010 }
 0x365   : > { %v952_v49 = vmul.f32 %v2011_v45, %v951_v43 }
 0x367   : > { %v954_v56 = vadd.f32 %v953_v50, %v952_v49 }
 0x369   : > { %955 = vst [vmem:[#allocation2] sm:$0x3] %v954_v56 }
 0x36a   : > { %1829 = vst [vmem:[%s1702_s10 + $0x6] sm:$0x3] %v954_v56  ;;  %s1602_s10 = sadd.s32 %s3375_s23, %s1857_s30 }
 0x36b   : > { %s1852_s28 = sshll.u32 %s1602_s10, 1 }
 0x370   : > { %v3165_v23 = vld [vmem:[#allocation2] sm:$0x3] }
 0x371   : > { %1029 = vmatmul.f32.vlgmr.msrb.gmra.mxu0 %v3165_v23  ;;  %1049 = vmatmul.f32.vlgmr.msrb.gmra.mxu1 %v3165_v23 }
 0x372   : > { %1069 = vmatmul.f32.vlgmr.msrb.gmra.mxu2 %v3165_v23  ;;  %1367 = vmatpush.msrb.mxu0 %v2887_v30 }
 0x373   : > { %1484 = vmatpush.msrb.mxu1 %v2881_v26  ;;  %1504 = vmatpush.msrb.mxu2 %v2884_v29 }
 0x374   : > { %1368 = vmatpush.msrb.mxu0 %v2899_v33 }
 0x375   : > { %1485 = vmatpush.msrb.mxu1 %v2893_v31  ;;  %1505 = vmatpush.msrb.mxu2 %v2896_v32 }
 0x376   : > { %1369 = vmatpush.msrb.mxu0 %v2913_v38 }
 0x377   : > { %1486 = vmatpush.msrb.mxu1 %v2907_v36  ;;  %1506 = vmatpush.msrb.mxu2 %v2910_v37  ;;  %v963_v36 = vld [vmem:[%s962_s5] sm:$0x3f] }
 0x378   : > { %1370 = vmatpush.msrb.mxu0 %v2927_v42 }
 0x379   : > { %1487 = vmatpush.msrb.mxu1 %v2921_v40  ;;  %1507 = vmatpush.msrb.mxu2 %v2924_v41 }
 0x37a   : > { %1371 = vmatpush.msrb.mxu0 %v2943_v48 }
 0x37b   : > { %1488 = vmatpush.msrb.mxu1 %v2937_v46  ;;  %1508 = vmatpush.msrb.mxu2 %v2940_v47 }
 0x37c   : > { %1372 = vmatpush.msrb.mxu0 %v2958_v55 }
 0x37d   : > { %1489 = vmatpush.msrb.mxu1 %v2952_v53  ;;  %1509 = vmatpush.msrb.mxu2 %v2955_v54 }
 0x37e   : > { %1373 = vmatpush.msrb.mxu0 %v2971_v59 }
 0x37f   : > { %1490 = vmatpush.msrb.mxu1 %v2965_v57  ;;  %1510 = vmatpush.msrb.mxu2 %v2968_v58 }
 0x380   : > { %1374 = vmatpush.msrb.mxu0 %v2984_v62 }
 0x381   : > { %1491 = vmatpush.msrb.mxu1 %v2978_v60  ;;  %1511 = vmatpush.msrb.mxu2 %v2981_v61 }
 0x382   : > { %1375 = vmatpush.msrb.mxu0 %v2997_v1 }
 0x383   : > { %1492 = vmatpush.msrb.mxu1 %v2991_v63  ;;  %1512 = vmatpush.msrb.mxu2 %v2994_v0 }
 0x384   : > { %1376 = vmatpush.msrb.mxu0 %v3010_v5 }
 0x385   : > { %1493 = vmatpush.msrb.mxu1 %v3004_v3  ;;  %1513 = vmatpush.msrb.mxu2 %v3007_v4 }
 0x386   : > { %1377 = vmatpush.msrb.mxu0 %v3023_v9 }
 0x387   : > { %1494 = vmatpush.msrb.mxu1 %v3017_v7  ;;  %1514 = vmatpush.msrb.mxu2 %v3020_v8 }
 0x388   : > { %1378 = vmatpush.msrb.mxu0 %v3038_v14 }
 0x389   : > { %1495 = vmatpush.msrb.mxu1 %v3032_v11  ;;  %1515 = vmatpush.msrb.mxu2 %v3035_v12  ;;  %v1100_v11 = vrot.slane %v963_v36, 4 }
 0x38a   : > { %1379 = vmatpush.msrb.mxu0 %v3052_v19 }
 0x38b   : > { %1496 = vmatpush.msrb.mxu1 %v3046_v15  ;;  %1516 = vmatpush.msrb.mxu2 %v3049_v18 }
 0x38c   : > { %1380 = vmatpush.msrb.mxu0 %v3064_v24 }
 0x38d   : > { %1497 = vmatpush.msrb.mxu1 %v3058_v21  ;;  %1517 = vmatpush.msrb.mxu2 %v3061_v22 }
 0x38e   : > { %1381 = vmatpush.msrb.mxu0 %v3077_v28 }
 0x38f   : > { %1498 = vmatpush.msrb.mxu1 %v3068_v25  ;;  %1518 = vmatpush.msrb.mxu2 %v3071_v27 }
 0x390   : > { %1382 = vmatpush.msrb.mxu0 %v3090_v20 }
 0x391   : > { %1499 = vmatpush.msrb.mxu1 %v3081_v13  ;;  %1519 = vmatpush.msrb.mxu2 %v3084_v16 }
 0x3ee   : > { %v1030_v26 = vpop.f32.mrf.mxu0  ;;  %v1050_v29 = vpop.f32.mrf.mxu1 }
 0x3ef   : > { %v1051_v31 = vadd.f32 %v1050_v29, %v2829_v51  ;;  %v1031_v32 = vadd.f32 %v1030_v26, %v2831_v52 }
 0x3f1   : > { %v1075_v37 = vrot.slane %v1051_v31, 6 }
 0x3f3   : > { %v1076_v40 = vsel %vm449_vm0, %v1031_v32, %v1075_v37 }
 0x3f4   : > { %v1078_v41 = vadd.f32 %v1076_v40, %v963_v36 }
 0x3f5   : > { %v1070_v0 = vpop.f32.mrf.mxu2 }
 0x3f6   : > { %v1831_v46 = vmul.f32 -1.442695, %v1078_v41  ;;  %v1071_v7 = vadd.f32 %v1070_v0, %v2837_v2 }
 0x3f8   : > { %2012 = vpow2.f32 %v1831_v46 }
 0x3fe   : > { %v2013_v47 = vpop.eup %2012 }
 0x3ff   : > { %v1082_v53 = vadd.f32 1.0, %v2013_v47  ;;  %v1839_v47 = vld [vmem:[%s1718_s7 + $0x24] sm:$0x3f] }
 0x401   : > { %2014 = vrcp.f32 %v1082_v53  ;;  %v1094_v60 = vand.u32 2147483648, %v1082_v53  ;;  %v1092_v63 = vand.u32 2147483647, %v1082_v53  ;;  %vm1088_vm3 = vweird.f32 %v1082_v53 }
 0x403   : > { %v1095_v4 = vor.u32 1.1754944e-38, %v1094_v60  ;;  %vm1093_vm5 = vcmp.eq.f32.partialorder %v1092_v63, 8.507059e+37 }
 0x407   : > { %v2015_v54 = vpop.eup %2014 }
 0x408   : > { %v1084_v57 = vmul.f32 %v2015_v54, %v1082_v53  ;;  %vm1089_vm2 = vweird.f32 %v2015_v54 }
 0x409   : > { %vm1090_vm4 = vmor %vm1088_vm3, %vm1089_vm2 }
 0x40a   : > { %v1085_v58 = vsub.f32 1.0, %v1084_v57 }
 0x40c   : > { %v1086_v61 = vmul.f32 %v2015_v54, %v1085_v58 }
 0x40e   : > { %v1087_v3 = vadd.f32 %v2015_v54, %v1086_v61 }
 0x410   : > { %v1091_v8 = vsel %vm1090_vm4, %v2015_v54, %v1087_v3 }
 0x411   : > { %v1096_v12 = vsel %vm1093_vm5, %v1095_v4, %v1091_v8 }
 0x412   : > { %v1098_v15 = vmul.f32 %v1096_v12, %v1071_v7  ;;  %v1105_v21 = vrot.slane %v1096_v12, 2 }
 0x414   : > { %v1102_v18 = vadd.f32 %v1100_v11, %v1098_v15  ;;  %v1107_v22 = vsub.f32 1.0, %v1105_v21  ;;  %v1109_v13 = vmul.f32 %v1105_v21, %v3165_v23 }
 0x416   : > { %2016 = vtanh.f32 %v1102_v18 }
 0x41c   : > { %v2017_v25 = vpop.eup %2016 }
 0x41d   : > { %v1108_v27 = vmul.f32 %v2017_v25, %v1107_v22  ;;  %v1414_v22 = vrot.slane %v1839_v47, 4 }
 0x41f   : > { %v1110_v16 = vadd.f32 %v1109_v13, %v1108_v27 }
 0x421   : > { %1111 = vst [vmem:[#allocation2] sm:$0x3] %v1110_v16 }
 0x422   : > { %1114 = vst [vmem:[%s1113_s6] sm:$0x3] %v1110_v16  ;;  %s1604_s6 = scalar_lea.hbm %s3376_s9, %s1852_s28 }
 0x423   : > { %s1607_s26 = sshll.u32 %s1604_s6, 4  ;;  %s1608_s26 = int_to_ptr.hbm [resolvable:$true] %s1607_s26 }
 0x424   : > { %s2140_s7 = sshra.s32 %s1608_s26, 4  ;;  %s2141_s7 = int_to_ptr.hbm [resolvable:$true] %s2140_s7 }
 0x425   : > { %s2142_s23 = scalar_lea.hbm %s2141_s7, 16  ;;  %p2147_p9 = scmp.lt.s32.totalorder %s2141_s7, %s3376_s9 }
 0x426   : > { %p2143_p6 = scmp.ne.s32.totalorder %s2141_s7, %s2142_s23  ;;  %p2148_p13 = scmp.lt.s32.totalorder %s2146_s19, %s2142_s23 }
 0x428   : > { %v1121_v6 = vld [vmem:[#allocation2] sm:$0x3]  ;;  %p2144_p7 = pnand %p2143_p6, %p2419_p0  ;;  %p2149_p2 = por %p2148_p13, %p2147_p9 }
 0x429   : > { %1186 = vmatmul.f32.vlgmr.msrb.gmra.mxu3 %v1121_v6  ;;  %1206 = vmatmul.f32.vlgmr.msra.gmra.mxu0 %v1121_v6 }
 0x42a   : > { %1226 = vmatmul.f32.vlgmr.msra.gmra.mxu1 %v1121_v6  ;;  %1524 = vmatpush.msrb.mxu3 %v2887_v30  ;;  %p2145_p10 = pneg %p2144_p7 }
 0x42c   : > { %1525 = vmatpush.msrb.mxu3 %v2899_v33  ;;  %p2150_p3 = pnand %p2149_p2, %p2145_p10 }
 0x42e   : > { %1526 = vmatpush.msrb.mxu3 %v2913_v38 }
 0x430   : > { %1527 = vmatpush.msrb.mxu3 %v2927_v42 }
 0x432   : > { %1528 = vmatpush.msrb.mxu3 %v2943_v48  ;;  %v1834_v48 = vld [vmem:[%s1710_s22 + $0x1e] sm:$0x3f] }
 0x433   : > { %v1257_v43 = vrot.slane %v1834_v48, 4 }
 0x434   : > { %1529 = vmatpush.msrb.mxu3 %v2958_v55 }
 0x436   : > { %1530 = vmatpush.msrb.mxu3 %v2971_v59 }
 0x438   : > { %1531 = vmatpush.msrb.mxu3 %v2984_v62 }
 0x43a   : > { %1532 = vmatpush.msrb.mxu3 %v2997_v1 }
 0x43c   : > { %1533 = vmatpush.msrb.mxu3 %v3010_v5 }
 0x43e   : > { %1534 = vmatpush.msrb.mxu3 %v3023_v9 }
 0x440   : > { %1535 = vmatpush.msrb.mxu3 %v3038_v14 }
 0x442   : > { %1536 = vmatpush.msrb.mxu3 %v3052_v19 }
 0x444   : > { %1537 = vmatpush.msrb.mxu3 %v3064_v24 }
 0x446   : > { %1538 = vmatpush.msrb.mxu3 %v3077_v28 }
 0x448   : > { %1539 = vmatpush.msrb.mxu3 %v3090_v20 }
 0x4a6   : > { %v1207_v30 = vpop.f32.mrf.mxu0 }
 0x4a7   : > { %v1208_v33 = vadd.f32 %v1207_v30, %v2829_v51  ;;  %v1227_v35 = vpop.f32.mrf.mxu1 }
 0x4a8   : > { %v1228_v17 = vadd.f32 %v1227_v35, %v2837_v2 }
 0x4a9   : > { %v1232_v42 = vrot.slane %v1208_v33, 6 }
 0x4ac   : > { %v1187_v38 = vpop.f32.mrf.mxu3 }
 0x4ad   : > { %v1188_v55 = vadd.f32 %v1187_v38, %v2831_v52 }
 0x4af   : > { %v1233_v59 = vsel %vm449_vm0, %v1188_v55, %v1232_v42 }
 0x4b0   : > { %v1235_v62 = vadd.f32 %v1834_v48, %v1233_v59 }
 0x4b2   : > { %v1835_v1 = vmul.f32 -1.442695, %v1235_v62 }
 0x4b4   : > { %2018 = vpow2.f32 %v1835_v1 }
 0x4ba   : > { %v2019_v5 = vpop.eup %2018 }
 0x4bb   : > { %v1239_v9 = vadd.f32 1.0, %v2019_v5  ;;  %v1844_v5 = vld [vmem:[%s1726_s12 + $0x2a] sm:$0x3f] }
 0x4bd   : > { %2020 = vrcp.f32 %v1239_v9  ;;  %v1251_v28 = vand.u32 2147483648, %v1239_v9  ;;  %v1249_v34 = vand.u32 2147483647, %v1239_v9  ;;  %vm1245_vm7 = vweird.f32 %v1239_v9 }
 0x4bf   : > { %v1252_v39 = vor.u32 1.1754944e-38, %v1251_v28  ;;  %vm1250_vm9 = vcmp.eq.f32.partialorder %v1249_v34, 8.507059e+37 }
 0x4c3   : > { %v2021_v14 = vpop.eup %2020 }
 0x4c4   : > { %v1241_v19 = vmul.f32 %v2021_v14, %v1239_v9  ;;  %vm1246_vm6 = vweird.f32 %v2021_v14 }
 0x4c5   : > { %vm1247_vm8 = vmor %vm1245_vm7, %vm1246_vm6 }
 0x4c6   : > { %v1242_v24 = vsub.f32 1.0, %v1241_v19 }
 0x4c8   : > { %v1243_v20 = vmul.f32 %v2021_v14, %v1242_v24 }
 0x4ca   : > { %v1244_v10 = vadd.f32 %v2021_v14, %v1243_v20 }
 0x4cc   : > { %v1248_v44 = vsel %vm1247_vm8, %v2021_v14, %v1244_v10 }
 0x4cd   : > { %v1253_v45 = vsel %vm1250_vm9, %v1252_v39, %v1248_v44 }
 0x4ce   : > { %v1255_v49 = vmul.f32 %v1253_v45, %v1228_v17  ;;  %v1262_v56 = vrot.slane %v1253_v45, 2 }
 0x4d0   : > { %v1259_v50 = vadd.f32 %v1257_v43, %v1255_v49  ;;  %v1264_v23 = vsub.f32 1.0, %v1262_v56  ;;  %v1266_v31 = vmul.f32 %v1262_v56, %v1121_v6 }
 0x4d2   : > { %2022 = vtanh.f32 %v1259_v50  ;;  %v1571_v50 = vrot.slane %v1844_v5, 4 }
 0x4d8   : > { %v2023_v26 = vpop.eup %2022 }
 0x4d9   : > { %v1265_v29 = vmul.f32 %v2023_v26, %v1264_v23 }
 0x4db   : > { %v1267_v32 = vadd.f32 %v1266_v31, %v1265_v29 }
 0x4dd   : > { %1837 = vst [vmem:[%s1714_s4 + $0xa] sm:$0x3] %v1267_v32  ;;  %s1730_s4 = scalar_lea.vmem %s2498_s17, %s1846_s18 [#allocation9] }
 0x4de   : > { %1268 = vst [vmem:[#allocation2] sm:$0x3] %v1267_v32 }
 0x4e5   : > { %v1278_v36 = vld [vmem:[#allocation2] sm:$0x3] }
 0x4e6   : > { %1343 = vmatmul.f32.vlgmr.msra.gmra.mxu2 %v1278_v36  ;;  %1363 = vmatmul.f32.vlgmr.msra.gmra.mxu3 %v1278_v36 }
 0x4e7   : > { %1383 = vmatmul.f32.vlgmr.msrb.gmra.mxu0 %v1278_v36 }
 0x564   : > { %v1384_v11 = vpop.f32.mrf.mxu0 }
 0x565   : > { %v1385_v18 = vadd.f32 %v1384_v11, %v2837_v2 }
 0x569   : > { %v1344_v37 = vpop.f32.mrf.mxu2  ;;  %v1364_v40 = vpop.f32.mrf.mxu3 }
 0x56a   : > { %v1365_v41 = vadd.f32 %v1364_v40, %v2829_v51  ;;  %v1345_v46 = vadd.f32 %v1344_v37, %v2831_v52 }
 0x56c   : > { %v1389_v53 = vrot.slane %v1365_v41, 6 }
 0x56e   : > { %v1390_v54 = vsel %vm449_vm0, %v1345_v46, %v1389_v53 }
 0x56f   : > { %v1392_v57 = vadd.f32 %v1839_v47, %v1390_v54 }
 0x571   : > { %v1840_v58 = vmul.f32 -1.442695, %v1392_v57 }
 0x573   : > { %2024 = vpow2.f32 %v1840_v58 }
 0x579   : > { %v2025_v60 = vpop.eup %2024 }
 0x57a   : > { %v1396_v61 = vadd.f32 1.0, %v2025_v60 }
 0x57c   : > { %2026 = vrcp.f32 %v1396_v61  ;;  %v1408_v4 = vand.u32 2147483648, %v1396_v61  ;;  %v1406_v8 = vand.u32 2147483647, %v1396_v61  ;;  %vm1402_vm11 = vweird.f32 %v1396_v61 }
 0x57e   : > { %v1409_v15 = vor.u32 1.1754944e-38, %v1408_v4  ;;  %vm1407_vm13 = vcmp.eq.f32.partialorder %v1406_v8, 8.507059e+37 }
 0x582   : > { %v2027_v63 = vpop.eup %2026 }
 0x583   : > { %v1398_v0 = vmul.f32 %v2027_v63, %v1396_v61  ;;  %vm1403_vm10 = vweird.f32 %v2027_v63 }
 0x584   : > { %vm1404_vm12 = vmor %vm1402_vm11, %vm1403_vm10 }
 0x585   : > { %v1399_v3 = vsub.f32 1.0, %v1398_v0 }
 0x587   : > { %v1400_v7 = vmul.f32 %v2027_v63, %v1399_v3 }
 0x589   : > { %v1401_v12 = vadd.f32 %v2027_v63, %v1400_v7 }
 0x58b   : > { %v1405_v21 = vsel %vm1404_vm12, %v2027_v63, %v1401_v12 }
 0x58c   : > { %v1410_v25 = vsel %vm1407_vm13, %v1409_v15, %v1405_v21 }
 0x58d   : > { %v1412_v27 = vmul.f32 %v1410_v25, %v1385_v18  ;;  %v1419_v16 = vrot.slane %v1410_v25, 2 }
 0x58f   : > { %v1416_v13 = vadd.f32 %v1414_v22, %v1412_v27  ;;  %v1421_v6 = vsub.f32 1.0, %v1419_v16  ;;  %v1423_v38 = vmul.f32 %v1419_v16, %v1278_v36 }
 0x591   : > { %2028 = vtanh.f32 %v1416_v13 }
 0x597   : > { %v2029_v30 = vpop.eup %2028 }
 0x598   : > { %v1422_v33 = vmul.f32 %v2029_v30, %v1421_v6 }
 0x59a   : > { %v1424_v42 = vadd.f32 %v1423_v38, %v1422_v33 }
 0x59c   : > { %1425 = vst [vmem:[#allocation2] sm:$0x3] %v1424_v42 }
 0x59d   : > { %1842 = vst [vmem:[%s1722_s1 + $0xc] sm:$0x3] %v1424_v42 }
 0x5a3   : > { %v1435_v48 = vld [vmem:[#allocation2] sm:$0x3] }
 0x5a4   : > { %1500 = vmatmul.f32.vlgmr.msrb.gmra.mxu1 %v1435_v48  ;;  %1520 = vmatmul.f32.vlgmr.msrb.gmra.mxu2 %v1435_v48 }
 0x5a5   : > { %1540 = vmatmul.f32.vlgmr.msrb.gmra.mxu3 %v1435_v48 }
 0x621   : > { %v1501_v55 = vpop.f32.mrf.mxu1 }
 0x622   : > { %v1502_v1 = vadd.f32 %v1501_v55, %v2831_v52 }
 0x627   : > { %v1521_v59 = vpop.f32.mrf.mxu2 }
 0x628   : > { %v1522_v62 = vadd.f32 %v1521_v59, %v2829_v51  ;;  %v1541_v17 = vpop.f32.mrf.mxu3 }
 0x629   : > { %v1542_v45 = vadd.f32 %v1541_v17, %v2837_v2 }
 0x62a   : > { %v1546_v9 = vrot.slane %v1522_v62, 6 }
 0x62c   : > { %v1547_v14 = vsel %vm449_vm0, %v1502_v1, %v1546_v9 }
 0x62d   : > { %v1549_v19 = vadd.f32 %v1844_v5, %v1547_v14 }
 0x62f   : > { %v1845_v24 = vmul.f32 -1.442695, %v1549_v19 }
 0x631   : > { %2030 = vpow2.f32 %v1845_v24 }
 0x637   : > { %v2031_v28 = vpop.eup %2030 }
 0x638   : > { %v1553_v20 = vadd.f32 1.0, %v2031_v28 }
 0x63a   : > { %2032 = vrcp.f32 %v1553_v20  ;;  %v1565_v51 = vand.u32 2147483648, %v1553_v20  ;;  %v1563_v52 = vand.u32 2147483647, %v1553_v20  ;;  %vm1559_vm0 = vweird.f32 %v1553_v20 }
 0x63c   : > { %v1566_v43 = vor.u32 1.1754944e-38, %v1565_v51  ;;  %vm1564_vm1 = vcmp.eq.f32.partialorder %v1563_v52, 8.507059e+37 }
 0x640   : > { %v2033_v34 = vpop.eup %2032 }
 0x641   : > { %v1555_v35 = vmul.f32 %v2033_v34, %v1553_v20  ;;  %vm1560_vm14 = vweird.f32 %v2033_v34 }
 0x642   : > { %vm1561_vm15 = vmor %vm1559_vm0, %vm1560_vm14 }
 0x643   : > { %v1556_v10 = vsub.f32 1.0, %v1555_v35 }
 0x645   : > { %v1557_v39 = vmul.f32 %v2033_v34, %v1556_v10 }
 0x647   : > { %v1558_v44 = vadd.f32 %v2033_v34, %v1557_v39 }
 0x649   : > { %v1562_v49 = vsel %vm1561_vm15, %v2033_v34, %v1558_v44 }
 0x64a   : > { %v1567_v56 = vsel %vm1564_vm1, %v1566_v43, %v1562_v49 }
 0x64b   : > { %v1569_v23 = vmul.f32 %v1567_v56, %v1542_v45  ;;  %v1576_v29 = vrot.slane %v1567_v56, 2 }
 0x64d   : > { %v1573_v26 = vadd.f32 %v1571_v50, %v1569_v23  ;;  %v1578_v31 = vsub.f32 1.0, %v1576_v29  ;;  %v1580_v36 = vmul.f32 %v1576_v29, %v1435_v48 }
 0x64f   : > { %2034 = vtanh.f32 %v1573_v26 }
 0x655   : > { %v2035_v2 = vpop.eup %2034 }
 0x656   : > { %v1579_v32 = vmul.f32 %v2035_v2, %v1578_v31 }
 0x658   : > { %v1581_v37 = vadd.f32 %v1580_v36, %v1579_v32 }
 0x65a   : > { %1582 = vst [vmem:[#allocation2] sm:$0x3] %v1581_v37 }
 0x65b   : > { %1847 = vst [vmem:[%s1730_s4 + $0xe] sm:$0x3] %v1581_v37 }
 0x65c   : > { %2153 = shalt.err (!%p2150_p3)
}
 0x65d   : > { %s2260_s29 = smov 32   ;;  %s2261_s17 = smov 64  }
 0x65e   : > { %s2262_s8 = smov 2  }
 0x65f   : > { %1873 = dma.vmem_to_hbm [thread:$0]  (%p2419_p0), %s1606_s25, 256, %s1608_s26, %s1587_s27, %s2260_s29, %s2261_s17, %s2262_s8  }
 0x660 PF: > { %s3378_s11 = sld [smem:[#allocation17_spill]] }
 0x661   : > { %s3379_s20 = sld [smem:[#allocation13_spill]] }
 0x662   : > { %s3380_s30 = sld [smem:[#allocation23_spill]] }
 0x666   : > { %p1890_p5 = scmp.ge.s32.totalorder %s3378_s11, 2 }
 0x667   : > { %s1622_s10 = sand.u32 1, %s3379_s20  }
 0x668   : > { %p3381_p8 = scmp.ne.s32.totalorder %s3380_s30, 0  ;;  %s1623_s28 = scalar_lea.sflag [#allocation5], %s1622_s10 }
 0x66a   : > { %p1886_p11 = pnand %p1890_p5, %p3381_p8 }
 0x66c   : > { %p1887_p12 = pneg %p1886_p11 }
 0x66e   : > { %2207 = dma.done.wait (%p1887_p12), %s1623_s28, 256  }
 0x66f   : > { %2209 = vsyncadd (%p1887_p12), %s1623_s28, 4294967040  ;;  %s22_s22 = sadd.s32 1, %s3378_s11   ;;  %s3382_s18 = sld [smem:[#allocation21_spill]] }
 0x670   : > { %p19_p1 = scmp.ge.s32.totalorder %s22_s22, 6   ;;  %s3383_s24 = sld [smem:[#allocation14_spill]] }
 0x671   : > { %s3384_s17 = sld [smem:[#allocation22_spill]]  ;;  %s3388_s12 = smov %s2216_s13 }
 0x672   : > { %s3385_s5 = sld [smem:[#allocation16_spill]]  ;;  %s3389_s13 = smov %s2220_s14 }
 0x673   : > { %s3386_s20 = sld [smem:[#allocation18_spill]]  ;;  %s3391_s15 = smov %s2228_s16 }
 0x674   : > { %s3387_s6 = sld [smem:[#allocation19_spill]]  ;;  %s3394_s19 = smov %s2248_s21 }
 0x675   : > { %s3390_s14 = smov %s3382_s18 }
 0x676   : > { %s3392_s16 = smov %s3383_s24  ;;  %21 = sbr.rel (!%p19_p1) target bundleno = 14 (0xe), region = 121 }
 0x678   : > { %s3393_s18 = smov %s3385_s5 }
 0x67a   : > { %s3395_s21 = smov %s3387_s6 }
 0x67b   :  { %1629 = vsyncpa [#allocation4], 1 }
 0x67c   :  { %1631 = vsyncpa [#allocation4 + $0x1], 1 }
 0x67d   :  { %1632 = vsyncpa [#allocation7], 1 }
 0x67e   :  { %1634 = vsyncpa [#allocation7 + $0x1], 1 }
 0x67f   :  { %1635 = vsyncpa [#allocation5], 1 }
 0x680   :  { %1637 = vsyncpa [#allocation5 + $0x1], 1 }

</bundles_post_ra>
